<compile_context>
chip_gen: v5e
topology: v5e:2x2
jax: 0.10.0
libtpu: 0.0.40
codegen_flags: <defaults>
</compile_context>

<pallas_src>
import functools

import jax
import jax.numpy as jnp
from jax.experimental import pallas as pl
from jax.experimental.pallas import tpu as pltpu


def _round_up(v, m):
    return ((v + m - 1) // m) * m


def _vmem_cap_bytes():
    # Generation-aware cap: v7x has 64 MiB physical VMEM per TensorCore,
    # v5e/v6e have 128 MiB.
    try:
        kind = jax.devices()[0].device_kind.lower()
    except Exception:
        return 48 * 1024 * 1024
    if "7" in kind:
        return 48 * 1024 * 1024
    return 96 * 1024 * 1024


def _vmem_limit_bytes(tile, f, hdim, d, g):
    lane = lambda v: _round_up(max(int(v), 1), 128)
    sub = lambda v: _round_up(max(int(v), 1), 8)
    w = 2 * d + 2
    need = 4 * (
        2 * tile * lane(f)                       # x tile, double-buffered (lane-padded)
        + 2 * tile * lane(d)                     # h_node tile
        + 2 * tile * lane(1)                     # gumbel-noise column (padded to 128 lanes)
        + 2 * sub(1) * tile                      # batch row [1, tile]
        + 2 * (sub(f) * lane(hdim)               # w1 / b1 / wdiff (resident, small)
               + sub(1) * lane(hdim)
               + sub(hdim) * lane(1))
        + 2 * sub(g) * lane(w)                   # resident [G, 2D+2] accumulator block
        + sub(g) * tile                          # onehot temp
        + tile * lane(w)                         # rhs temp
        + tile * lane(hdim)                      # h1 temp
    )
    return int(min(max(2 * need, 32 * 1024 * 1024), _vmem_cap_bytes()))


def _separator_gum_kernel(
    x_ref,        # [tile, F]      node input features
    w1_ref,       # [F, H]         rationale_gnn_node weight (resident)
    b1_ref,       # [1, H]         rationale_gnn_node bias   (resident)
    wdiff_ref,    # [H, 1]         gate_nn weight difference (col1 - col0)
    noise_ref,    # [tile, 1]      gumbel noise difference + bias difference
    h_ref,        # [tile, D]      h_node tile (padded rows MUST be zero)
    batch_ref,    # [1, tile] i32  node -> graph assignment (lane-dense row)
    out_ref,      # [G, 2D+2]      per-core resident accumulator
    *,
    n_nodes,      # true (unpadded) node count, static
):
    c = pl.program_id(0)                 # core / parallel axis
    i = pl.program_id(1)                 # node-tile reduction axis (per core)
    tn = x_ref.shape[0]
    d = h_ref.shape[1]
    g = out_ref.shape[0]

    @pl.when(i == 0)
    def _init():
        out_ref[...] = jnp.zeros_like(out_ref)

    # Row-validity mask for the padded tail of the node axis.
    base = (c * pl.num_programs(1) + i) * tn
    row = base + jax.lax.broadcasted_iota(jnp.int32, (tn, 1), 0)
    valid = row < n_nodes                                            # [tile, 1]

    # rationale_gnn_node: Linear + ReLU.
    h1 = jnp.dot(x_ref[...], w1_ref[...],
                 preferred_element_type=jnp.float32) + b1_ref[...]
    h1 = jnp.maximum(h1, 0.0)                                        # [tile, H]

    # gumbel_softmax(gate_nn(x), dim=-1)[:, -1] == sigmoid(Δlogit + Δgumbel)
    logit = jnp.dot(h1, wdiff_ref[...],
                    preferred_element_type=jnp.float32) + noise_ref[...]  # [tile, 1]
    gate = pl.reciprocal(1.0 + jnp.exp(-logit), approx=False)        # sigmoid (EUP)
    gate = jnp.where(valid, gate, 0.0)
    env = jnp.where(valid, 1.0 - gate, 0.0)

    # Padded h_node rows are zero (wrapper contract) -> no [tile, D] mask needed.
    h = h_ref[...]                                                   # [tile, D]
    gh = gate * h
    # Fused pooling RHS: [gate*h | (1-gate)*h | gate | 1-gate]  -> [tile, 2D+2]
    rhs = jnp.concatenate([gh, h - gh, gate, env], axis=-1)

    # Lane-dense one-hot: graphs on sublanes, nodes on lanes -> canonical matmul.
    gid = jax.lax.broadcasted_iota(jnp.int32, (g, tn), 0)
    onehot = (gid == batch_ref[...]).astype(jnp.float32)             # [G, tile]

    out_ref[...] += jnp.dot(onehot, rhs, preferred_element_type=jnp.float32)


@functools.partial(jax.jit, static_argnames=("num_graphs", "block_n", "num_cores"))
def separator_gum_forward(x, w1, b1, wg, bg, gumbel_noise, h_node, batch,
                          num_graphs, block_n=2048, num_cores=2):
    """Glue: reparameterize the gate, pad N, call the kernel, finalize in JAX."""
    n, f = x.shape
    d = h_node.shape[1]
    hdim = w1.shape[1]
    g = num_graphs
    w = 2 * d + 2

    # softmax([a, b])[1] == sigmoid(b - a): fold the 2-logit gate into a
    # single-column weight / noise difference (exact).
    w_diff = wg[:, 1:2] - wg[:, 0:1]                                  # [H, 1]
    b_diff = bg[:, 1:2] - bg[:, 0:1]                                  # [1, 1]
    noise_eff = (gumbel_noise[:, 1:2] - gumbel_noise[:, 0:1]) + b_diff  # [N, 1]

    batch = batch.astype(jnp.int32)
    # Per-graph node counts (wrapper-side; drops the in-kernel `ones` column).
    counts = jnp.zeros((g,), jnp.float32).at[batch].add(1.0)[:, None]   # [G, 1]

    # Node tile: multiple of 128 (lane-dense [1, tile] batch block), <= block_n.
    tile = _round_up(min(block_n, max(1, -(-n // num_cores))), 128)
    n_pad = _round_up(n, num_cores * tile)
    tiles_per_core = n_pad // (num_cores * tile)
    pad = n_pad - n
    if pad:
        # Zero padding is part of the kernel contract: padded h_node rows must
        # be zero (the in-kernel mask only covers the gate / 1-gate columns).
        x = jnp.pad(x, ((0, pad), (0, 0)))
        noise_eff = jnp.pad(noise_eff, ((0, pad), (0, 0)))
        h_node = jnp.pad(h_node, ((0, pad), (0, 0)))
        batch = jnp.pad(batch, (0, pad))
    batch_row = batch.reshape(1, n_pad)

    kernel = functools.partial(_separator_gum_kernel, n_nodes=n)

    acc = pl.pallas_call(
        kernel,
        out_shape=jax.ShapeDtypeStruct((num_cores, g, w), jnp.float32),
        grid=(num_cores, tiles_per_core),
        in_specs=[
            pl.BlockSpec((tile, f), lambda c, i: (c * tiles_per_core + i, 0)),   # x
            pl.BlockSpec((f, hdim), lambda c, i: (0, 0)),                        # w1 (resident)
            pl.BlockSpec((1, hdim), lambda c, i: (0, 0)),                        # b1 (resident)
            pl.BlockSpec((hdim, 1), lambda c, i: (0, 0)),                        # w_diff
            pl.BlockSpec((tile, 1), lambda c, i: (c * tiles_per_core + i, 0)),   # noise_eff
            pl.BlockSpec((tile, d), lambda c, i: (c * tiles_per_core + i, 0)),   # h_node
            pl.BlockSpec((1, tile), lambda c, i: (0, c * tiles_per_core + i)),   # batch row
        ],
        out_specs=pl.BlockSpec((None, g, w), lambda c, i: (c, 0, 0)),            # per-core acc
        compiler_params=pltpu.CompilerParams(
            dimension_semantics=("parallel", "arbitrary"),   # cores x node-tile reduction
            vmem_limit_bytes=_vmem_limit_bytes(tile, f, hdim, d, g),
        ),
    )(x, w1, b1, w_diff, noise_eff, h_node, batch_row)

    # Combine per-core partial sums and finalize in XLA (cheap: [C, G, 2D+2]).
    acc = acc.sum(axis=0)                                             # [G, 2D+2]
    inv = 1.0 / jnp.maximum(counts, 1.0)
    h_out = acc[:, :d] * inv
    c_out = acc[:, d:2 * d] * inv
    r_num = acc[:, 2 * d:2 * d + 1] + 1e-8
    e_num = acc[:, 2 * d + 1:2 * d + 2] + 1e-8
    return h_out, c_out, r_num, e_num


def _reference(x, w1, b1, wg, bg, gumbel_noise, h_node, batch, num_graphs):
    """Pure-JAX reference of the original 2-logit forward (correctness check)."""
    hp = jax.lax.Precision.HIGHEST
    h1 = jnp.maximum(jnp.dot(x, w1, precision=hp) + b1, 0.0)
    logits = jnp.dot(h1, wg, precision=hp) + bg
    soft = jax.nn.softmax(logits + gumbel_noise, axis=-1)
    gate = soft[:, -1:]
    onehot = (batch[:, None] == jnp.arange(num_graphs)[None, :]).astype(jnp.float32)
    counts = jnp.maximum(onehot.sum(0), 1.0)[:, None]
    h_out = jnp.dot(onehot.T, gate * h_node, precision=hp) / counts
    c_out = jnp.dot(onehot.T, (1.0 - gate) * h_node, precision=hp) / counts
    r_num = jnp.dot(onehot.T, gate, precision=hp) + 1e-8
    e_num = jnp.dot(onehot.T, 1.0 - gate, precision=hp) + 1e-8
    return h_out, c_out, r_num, e_num


if __name__ == "__main__":
    key = jax.random.PRNGKey(0)
    k_x, k_w1, k_b1, k_wg, k_bg, k_h, k_u = jax.random.split(key, 7)

    N = 300         # total nodes (not a tile multiple -> exercises padding/mask)
    F_IN = 8        # node input feature dim
    H = 32          # rationale_gnn_node hidden dim
    D = 32          # h_node embedding dim
    G = 5           # number of graphs in the batch
    BLOCK_N = 128   # small tile so the test exercises the multi-step grid
    CORES = 2       # leading parallel grid axis (both TensorCores on v7x)

    x = jax.random.normal(k_x, (N, F_IN), dtype=jnp.float32)
    w1 = jax.random.normal(k_w1, (F_IN, H), dtype=jnp.float32) * 0.1
    b1 = jax.random.normal(k_b1, (1, H), dtype=jnp.float32) * 0.1
    wg = jax.random.normal(k_wg, (H, 2), dtype=jnp.float32) * 0.1
    bg = jax.random.normal(k_bg, (1, 2), dtype=jnp.float32) * 0.1
    h_node = jax.random.normal(k_h, (N, D), dtype=jnp.float32)

    # sorted node->graph assignment with uneven graph sizes
    sizes = jnp.array([70, 50, 90, 30, 60], dtype=jnp.int32)
    batch = jnp.repeat(jnp.arange(G, dtype=jnp.int32), sizes, total_repeat_length=N)

    # Gumbel(0, 1) noise, deterministic
    u = jax.random.uniform(k_u, (N, 2), dtype=jnp.float32,
                           minval=1e-6, maxval=1.0 - 1e-6)
    gumbel_noise = -jnp.log(-jnp.log(u))

    outs = separator_gum_forward(x, w1, b1, wg, bg, gumbel_noise, h_node, batch,
                                 num_graphs=G, block_n=BLOCK_N, num_cores=CORES)
    outs = jax.block_until_ready(outs)

    refs = _reference(x, w1, b1, wg, bg, gumbel_noise, h_node, batch, G)
    for o, r in zip(outs, refs):
        assert o.shape == r.shape, (o.shape, r.shape)
        assert jnp.allclose(o, r, atol=1e-3, rtol=1e-3), float(jnp.abs(o - r).max())

    print("KERNEL_OK")
</pallas_src>

<mosaic_0001>
module attributes {stable_mosaic.version = 11 : i64} {
  func.func @_separator_gum_kernel(%arg0: i32, %arg1: i32, %arg2: memref<128x8xf32, #tpu.memory_space<vmem>>, %arg3: memref<8x32xf32, #tpu.memory_space<vmem>>, %arg4: memref<1x32xf32, #tpu.memory_space<vmem>>, %arg5: memref<32x1xf32, #tpu.memory_space<vmem>>, %arg6: memref<128x1xf32, #tpu.memory_space<vmem>>, %arg7: memref<128x32xf32, #tpu.memory_space<vmem>>, %arg8: memref<1x128xi32, #tpu.memory_space<vmem>>, %arg9: memref<1x5x66xf32, #tpu.memory_space<vmem>>) attributes {dimension_semantics = [#tpu.dimension_semantics<parallel>, #tpu.dimension_semantics<arbitrary>], iteration_bounds = array<i64: 2, 2>, scalar_prefetch = 0 : i64, scratch_operands = 0 : i64, tpu.core_type = #tpu.core_type<tc>, window_params = [{transform_indices = @transform_0, window_bounds = array<i64: 128, 8>}, {pipeline_mode = #tpu.pipeline_mode<synchronous>, transform_indices = @transform_1, window_bounds = array<i64: 8, 32>}, {pipeline_mode = #tpu.pipeline_mode<synchronous>, transform_indices = @transform_2, window_bounds = array<i64: 1, 32>}, {pipeline_mode = #tpu.pipeline_mode<synchronous>, transform_indices = @transform_3, window_bounds = array<i64: 32, 1>}, {transform_indices = @transform_4, window_bounds = array<i64: 128, 1>}, {transform_indices = @transform_5, window_bounds = array<i64: 128, 32>}, {transform_indices = @transform_6, window_bounds = array<i64: 1, 128>}, {transform_indices = @transform_7, window_bounds = array<i64: 1, 5, 66>}]} {
    %c0_i32 = arith.constant 0 : i32
    %0 = arith.cmpi eq, %arg1, %c0_i32 : i32
    %1 = arith.extui %0 : i1 to i32
    %c0_i32_0 = arith.constant 0 : i32
    %2 = arith.cmpi ne, %1, %c0_i32_0 : i32
    scf.if %2 {
      %cst_28 = arith.constant 0.000000e+00 : f32
      %53 = vector.broadcast %cst_28 : f32 to vector<5x66xf32>
      %c0_29 = arith.constant 0 : index
      %c0_30 = arith.constant 0 : index
      %c0_31 = arith.constant 0 : index
      %54 = vector.load %arg9[%c0_29, %c0_30, %c0_31] : memref<1x5x66xf32, #tpu.memory_space<vmem>>, vector<1x5x66xf32>
      %55 = vector.shape_cast %54 : vector<1x5x66xf32> to vector<5x66xf32>
      %56 = vector.shape_cast %53 : vector<5x66xf32> to vector<1x5x66xf32>
      tpu.vector_store %arg9[%c0_29, %c0_30, %c0_31], %56 {strides = array<i32>} : memref<1x5x66xf32, #tpu.memory_space<vmem>>, vector<1x5x66xf32>,
    } else {
    }
    %c2_i32 = arith.constant 2 : i32
    %3 = arith.muli %arg0, %c2_i32 : i32
    %4 = arith.addi %3, %arg1 : i32
    %c128_i32 = arith.constant 128 : i32
    %5 = arith.muli %4, %c128_i32 : i32
    %6 = tpu.iota {dimensions = array<i32: 0>} : vector<128x1xi32>
    %7 = vector.broadcast %5 : i32 to vector<128x1xi32>
    %8 = arith.addi %7, %6 : vector<128x1xi32>
    %c300_i32 = arith.constant 300 : i32
    %9 = vector.broadcast %c300_i32 : i32 to vector<128x1xi32>
    %10 = arith.cmpi slt, %8, %9 : vector<128x1xi32>
    %c0 = arith.constant 0 : index
    %c0_1 = arith.constant 0 : index
    %11 = vector.load %arg2[%c0, %c0_1] : memref<128x8xf32, #tpu.memory_space<vmem>>, vector<128x8xf32>
    %c0_2 = arith.constant 0 : index
    %c0_3 = arith.constant 0 : index
    %12 = vector.load %arg3[%c0_2, %c0_3] : memref<8x32xf32, #tpu.memory_space<vmem>>, vector<8x32xf32>
    %cst = arith.constant dense<0.000000e+00> : vector<128x32xf32>
    %13 = tpu.matmul %11, %12, %cst {dimension_numbers = #tpu.dot_dimension_numbers<[1], [0], [0], [1], [0, 0, 1, 1], [], []>} : vector<128x8xf32>, vector<8x32xf32>, vector<128x32xf32> -> vector<128x32xf32>
    %c0_4 = arith.constant 0 : index
    %c0_5 = arith.constant 0 : index
    %14 = vector.load %arg4[%c0_4, %c0_5] : memref<1x32xf32, #tpu.memory_space<vmem>>, vector<1x32xf32>
    %15 = vector.broadcast %14 : vector<1x32xf32> to vector<128x32xf32>
    %16 = arith.addf %13, %15 : vector<128x32xf32>
    %cst_6 = arith.constant 0.000000e+00 : f32
    %17 = vector.broadcast %cst_6 : f32 to vector<128x32xf32>
    %18 = arith.maximumf %16, %17 : vector<128x32xf32>
    %c0_7 = arith.constant 0 : index
    %c0_8 = arith.constant 0 : index
    %19 = vector.load %arg5[%c0_7, %c0_8] : memref<32x1xf32, #tpu.memory_space<vmem>>, vector<32x1xf32>
    %cst_9 = arith.constant dense<0.000000e+00> : vector<128x1xf32>
    %20 = tpu.matmul %18, %19, %cst_9 {dimension_numbers = #tpu.dot_dimension_numbers<[1], [0], [0], [1], [0, 0, 1, 1], [], []>} : vector<128x32xf32>, vector<32x1xf32>, vector<128x1xf32> -> vector<128x1xf32>
    %c0_10 = arith.constant 0 : index
    %c0_11 = arith.constant 0 : index
    %21 = vector.load %arg6[%c0_10, %c0_11] : memref<128x1xf32, #tpu.memory_space<vmem>>, vector<128x1xf32>
    %22 = arith.addf %20, %21 : vector<128x1xf32>
    %cst_12 = arith.constant 0.000000e+00 : f32
    %23 = vector.broadcast %cst_12 : f32 to vector<128x1xf32>
    %24 = arith.subf %23, %22 : vector<128x1xf32>
    %25 = math.exp %24 : vector<128x1xf32>
    %cst_13 = arith.constant 1.000000e+00 : f32
    %26 = vector.broadcast %cst_13 : f32 to vector<128x1xf32>
    %27 = arith.addf %26, %25 : vector<128x1xf32>
    %28 = tpu.reciprocal %27 : vector<128x1xf32> -> vector<128x1xf32>
    %cst_14 = arith.constant 0.000000e+00 : f32
    %29 = vector.broadcast %cst_14 : f32 to vector<128x1xf32>
    %30 = arith.select %10, %28, %29 : vector<128x1xi1>, vector<128x1xf32>
    %cst_15 = arith.constant 1.000000e+00 : f32
    %31 = vector.broadcast %cst_15 : f32 to vector<128x1xf32>
    %32 = arith.subf %31, %30 : vector<128x1xf32>
    %cst_16 = arith.constant 0.000000e+00 : f32
    %33 = vector.broadcast %cst_16 : f32 to vector<128x1xf32>
    %34 = arith.select %10, %32, %33 : vector<128x1xi1>, vector<128x1xf32>
    %c0_17 = arith.constant 0 : index
    %c0_18 = arith.constant 0 : index
    %35 = vector.load %arg7[%c0_17, %c0_18] : memref<128x32xf32, #tpu.memory_space<vmem>>, vector<128x32xf32>
    %36 = vector.broadcast %30 : vector<128x1xf32> to vector<128x32xf32>
    %37 = arith.mulf %36, %35 : vector<128x32xf32>
    %38 = arith.subf %35, %37 : vector<128x32xf32>
    %39 = tpu.concatenate %37, %38, %30, %34 in 1 : vector<128x32xf32>, vector<128x32xf32>, vector<128x1xf32>, vector<128x1xf32> -> vector<128x66xf32>
    %40 = tpu.iota {dimensions = array<i32: 0>} : vector<5x128xi32>
    %c0_19 = arith.constant 0 : index
    %c0_20 = arith.constant 0 : index
    %41 = vector.load %arg8[%c0_19, %c0_20] : memref<1x128xi32, #tpu.memory_space<vmem>>, vector<1x128xi32>
    %42 = vector.broadcast %41 : vector<1x128xi32> to vector<5x128xi32>
    %43 = arith.cmpi eq, %40, %42 : vector<5x128xi32>
    %44 = arith.extui %43 : vector<5x128xi1> to vector<5x128xi32>
    %45 = arith.sitofp %44 : vector<5x128xi32> to vector<5x128xf32>
    %c0_21 = arith.constant 0 : index
    %c0_22 = arith.constant 0 : index
    %c0_23 = arith.constant 0 : index
    %46 = vector.load %arg9[%c0_21, %c0_22, %c0_23] : memref<1x5x66xf32, #tpu.memory_space<vmem>>, vector<1x5x66xf32>
    %47 = vector.shape_cast %46 : vector<1x5x66xf32> to vector<5x66xf32>
    %cst_24 = arith.constant dense<0.000000e+00> : vector<5x66xf32>
    %48 = tpu.matmul %45, %39, %cst_24 {dimension_numbers = #tpu.dot_dimension_numbers<[1], [0], [0], [1], [0, 0, 1, 1], [], []>} : vector<5x128xf32>, vector<128x66xf32>, vector<5x66xf32> -> vector<5x66xf32>
    %49 = arith.addf %47, %48 : vector<5x66xf32>
    %c0_25 = arith.constant 0 : index
    %c0_26 = arith.constant 0 : index
    %c0_27 = arith.constant 0 : index
    %50 = vector.load %arg9[%c0_25, %c0_26, %c0_27] : memref<1x5x66xf32, #tpu.memory_space<vmem>>, vector<1x5x66xf32>
    %51 = vector.shape_cast %50 : vector<1x5x66xf32> to vector<5x66xf32>
    %52 = vector.shape_cast %49 : vector<5x66xf32> to vector<1x5x66xf32>
    tpu.vector_store %arg9[%c0_25, %c0_26, %c0_27], %52 {strides = array<i32>} : memref<1x5x66xf32, #tpu.memory_space<vmem>>, vector<1x5x66xf32>,
    return
  }
  func.func @transform_0(%arg0: i32, %arg1: i32) -> (i32, i32) {
    %c2_i32 = arith.constant 2 : i32
    %0 = arith.muli %arg0, %c2_i32 : i32
    %1 = arith.addi %0, %arg1 : i32
    %c0_i32 = arith.constant 0 : i32
    %c0_i32_0 = arith.constant 0 : i32
    return %1, %c0_i32 : i32, i32
  }
  func.func @transform_1(%arg0: i32, %arg1: i32) -> (i32, i32) {
    %c0_i32 = arith.constant 0 : i32
    %c0_i32_0 = arith.constant 0 : i32
    %c0_i32_1 = arith.constant 0 : i32
    return %c0_i32, %c0_i32_0 : i32, i32
  }
  func.func @transform_2(%arg0: i32, %arg1: i32) -> (i32, i32) {
    %c0_i32 = arith.constant 0 : i32
    %c0_i32_0 = arith.constant 0 : i32
    %c0_i32_1 = arith.constant 0 : i32
    return %c0_i32, %c0_i32_0 : i32, i32
  }
  func.func @transform_3(%arg0: i32, %arg1: i32) -> (i32, i32) {
    %c0_i32 = arith.constant 0 : i32
    %c0_i32_0 = arith.constant 0 : i32
    %c0_i32_1 = arith.constant 0 : i32
    return %c0_i32, %c0_i32_0 : i32, i32
  }
  func.func @transform_4(%arg0: i32, %arg1: i32) -> (i32, i32) {
    %c2_i32 = arith.constant 2 : i32
    %0 = arith.muli %arg0, %c2_i32 : i32
    %1 = arith.addi %0, %arg1 : i32
    %c0_i32 = arith.constant 0 : i32
    %c0_i32_0 = arith.constant 0 : i32
    return %1, %c0_i32 : i32, i32
  }
  func.func @transform_5(%arg0: i32, %arg1: i32) -> (i32, i32) {
    %c2_i32 = arith.constant 2 : i32
    %0 = arith.muli %arg0, %c2_i32 : i32
    %1 = arith.addi %0, %arg1 : i32
    %c0_i32 = arith.constant 0 : i32
    %c0_i32_0 = arith.constant 0 : i32
    return %1, %c0_i32 : i32, i32
  }
  func.func @transform_6(%arg0: i32, %arg1: i32) -> (i32, i32) {
    %c2_i32 = arith.constant 2 : i32
    %0 = arith.muli %arg0, %c2_i32 : i32
    %1 = arith.addi %0, %arg1 : i32
    %c0_i32 = arith.constant 0 : i32
    %c0_i32_0 = arith.constant 0 : i32
    return %c0_i32, %1 : i32, i32
  }
  func.func @transform_7(%arg0: i32, %arg1: i32) -> (i32, i32, i32) {
    %c0_i32 = arith.constant 0 : i32
    %c0_i32_0 = arith.constant 0 : i32
    %c0_i32_1 = arith.constant 0 : i32
    return %arg0, %c0_i32, %c0_i32_0 : i32, i32, i32
  }
}

</mosaic_0001>

<bundles_post_ra>
// kernel: separator_gum_forward.1
= control target key start
LH: loop header
LB: loop body
LE: loop exit
PB: predicated region body
PF: predicated region fallthrough
CT: control target
= control target key end

     0   :  { %s1954_s24 = smov 0   ;;  %s1956_s25 = smov 0   ;;  %s2598_s0 = inlined_call_operand.vmem [shape: f32[512,8], index: 0, kind: input, shape index: {}]   ;;  %s2599_s1 = inlined_call_operand.vmem [shape: f32[8,32], index: 1, kind: input, shape index: {}]   ;;  %s2600_s2 = inlined_call_operand.vmem [shape: f32[1,32], index: 2, kind: input, shape index: {}]   ;;  %s2601_s3 = inlined_call_operand.vmem [shape: f32[32,1], index: 3, kind: input, shape index: {}]   ;;  %s2602_s4 = inlined_call_operand.vmem [shape: f32[512,1], index: 4, kind: input, shape index: {}]   ;;  %s2603_s5 = inlined_call_operand.vmem [shape: f32[512,32], index: 5, kind: input, shape index: {}]   ;;  %s2604_s6 = inlined_call_operand.vmem [shape: s32[1,512], index: 6, kind: input, shape index: {}]   ;;  %s2605_s7 = inlined_call_operand.vmem [shape: f32[2,5,66], index: 7, kind: output, shape index: {}]  }
   0x1   :  { %s1958_s26 = smov 0   ;;  %s1960_s27 = smov 0  }
   0x2   :  { %s1962_s28 = smov 0  }
   0x3 LB: > { %s26_s29 = sadd.s32 1, %s1898_s26  ;;  %s29_s30 = sadd.s32 1, %s1902_s27  ;;  %s1906_s28 = sphi %s1962_s28, %s17_s28   ;;  %s1902_s27 = sphi %s1960_s27, %s2610_s27   ;;  %s1898_s26 = sphi %s1958_s26, %s2609_s26   ;;  %s1894_s25 = sphi %s1956_s25, %s2608_s25   ;;  %s1890_s24 = sphi %s1954_s24, %s2607_s24  }
   0x4   : > { %p27_p0 = scmp.ge.s32.totalorder %s26_s29, 2  ;;  %p1577_p1 = scmp.ge.s32.totalorder %s1906_s28, 1 }
   0x5   : > { %p312_p2 = scmp.lt.s32.totalorder %s1906_s28, 5 }
   0x6   : > { %s2612_s29 = smov (%p27_p0, %s26_s29), 0  ;;  %s2614_s30 = smov (!%p27_p0, %s29_s30), %s1902_s27 }
   0x7   : > { %p313_p3 = pnand %p1577_p1, %p312_p2  ;;  %p31_p4 = scmp.ge.s32.totalorder %s2614_s30, 2 }
   0x8   : > { %s1578_s8 = sshll.u32 (!%p313_p3), %s1894_s25, 1  ;;  %p401_p7 = scmp.lt.s32.totalorder (!%p313_p3), %s1894_s25, 1 }
   0x9   : > { %s2616_s30 = smov (%p31_p4, %s2614_s30), 0  ;;  %316 = sbr.rel (%p313_p3) target bundleno = 854 (0x356), region = 48 }
   0xa   : > { %s1987_s9 = sadd.s32 (!%p313_p3), %s1890_s24, %s1578_s8  ;;  %p1589_p8 = scmp.ne.s32.totalorder (!%p313_p3), %s1890_s24, 0 }
   0xb   : > { %s1579_s10 = sshll.u32 (!%p313_p3), %s1987_s9, 4  ;;  %p396_p5 = scmp.lt.s32.totalorder (!%p313_p3), %s1987_s9, 3 }
   0xc   : > { %p367_p6 = scmp.lt.s32.totalorder (!%p313_p3), %s1579_s10, 63 }
   0xe   : > { %s1992_s11 = scalar_select %p396_p5, %s1987_s9, 3 }
   0xf   : > { %s2618_s10 = smov (!%p367_p6, %s1579_s10), 63  ;;  %s2620_s25 = smov (!%p401_p7, %s1894_s25), 1 }
  0x10   : > { %s1580_s15 = sshll.u32 %s2618_s10, 3  ;;  %s1588_s12 = sshll.u32 %s2620_s25, 3 }
  0x11   : > { %s2001_s18 = scalar_lea.vmem %s2598_s0, %s1580_s15  ;;  %s2006_s21 = scalar_lea.vmem %s2602_s4, %s1580_s15 }
  0x12   : > { %s2011_s8 = scalar_lea.vmem %s2603_s5, %s1580_s15  ;;  %s2016_s10 = scalar_lea.vmem %s2605_s7, %s1588_s12 }
  0x13   : > { %408 = sbr.rel (%p1589_p8) target bundleno = 26 (0x1a), region = 52 }
  0x18   : > { %vm409_vm0 = vcmask 536576   ;;  %v1908_v0 = vmov 0.0  }
  0x19   : > { %410 = vst.msk [vmem:[%s2016_s10] sm:$0x1f] %vm409_vm0, %v1908_v0 }
  0x1a PF: > { %v480_v1 = vld [vmem:[%s2599_s1] sm:$0xff]  ;;  %vm485_vm1 = vcmask 64512   ;;  %v465_v3 = vld [vmem:[%s2001_s18 + $0x8] sm:$0xff]  ;;  %v466_v4 = vld [vmem:[%s2001_s18 + $0x10] sm:$0xff]  ;;  %vm635_vm2 = vcmask 261120   ;;  %s1591_s13 = sshll.u32 %s1987_s9, 7  ;;  %s2606_s24 = scalar_lea.vmem %s2604_s6, %s1992_s11 }
  0x1b   : > { %v464_v2 = vld [vmem:[%s2001_s18] sm:$0xff]  ;;  %549 = vmatpush.msra.mxu0 %v480_v1  ;;  %1628 = vmatpush.msra.mxu2 %v480_v1  ;;  %v467_v5 = vld [vmem:[%s2001_s18 + $0x18] sm:$0xff]  ;;  %v473_v7 = vld [vmem:[%s2001_s18 + $0x48] sm:$0xff]  ;;  %s1910_s9 = smov 64   ;;  %s1912_s16 = smov 32  }
  0x1c   : > { %1592 = vmatmul.msk.f32.vlgmr.msra.gmra.mxu0 %vm485_vm1, %v464_v2  ;;  %v468_v6 = vld [vmem:[%s2001_s18 + $0x20] sm:$0xff]  ;;  %1601 = vmatmul.msk.f32.vlgmr.msra.gmra.mxu2 %vm485_vm1, %v473_v7  ;;  %v469_v8 = vld [vmem:[%s2001_s18 + $0x28] sm:$0xff]  ;;  %v474_v9 = vld [vmem:[%s2001_s18 + $0x50] sm:$0xff] }
  0x1d   : > { %v470_v10 = vld [vmem:[%s2001_s18 + $0x30] sm:$0xff]  ;;  %v475_v11 = vld [vmem:[%s2001_s18 + $0x58] sm:$0xff]  ;;  %v476_v14 = vld [vmem:[%s2001_s18 + $0x60] sm:$0xff] }
  0x1e   : > { %v618_v12 = vld [vmem:[%s2601_s3 + $0x18] sm:$0xff]  ;;  %v472_v15 = vld [vmem:[%s2001_s18 + $0x40] sm:$0xff]  ;;  %v477_v16 = vld [vmem:[%s2001_s18 + $0x68] sm:$0xff] }
  0x1f   : > { %696 = vmatpush.msra.mxu1 %v618_v12  ;;  %1629 = vmatpush.msra.mxu3 %v618_v12  ;;  %v471_v13 = vld [vmem:[%s2001_s18 + $0x38] sm:$0xff]  ;;  %v478_v17 = vld [vmem:[%s2001_s18 + $0x70] sm:$0xff]  ;;  %v616_v20 = vld [vmem:[%s2601_s3 + $0x8] sm:$0xff] }
  0x20   : > { %v479_v18 = vld [vmem:[%s2001_s18 + $0x78] sm:$0xff]  ;;  %v617_v19 = vld [vmem:[%s2601_s3 + $0x10] sm:$0xff]  ;;  %v615_v21 = vld [vmem:[%s2601_s3] sm:$0xff] }
  0x21   : > { %697 = vmatpush.msra.mxu1 %v617_v19  ;;  %1630 = vmatpush.msra.mxu3 %v617_v19  ;;  %v2070_v22 = vld [vmem:[%s2600_s2] ss:$0 sm:$0xff]  ;;  %v620_v12 = vld [vmem:[%s2006_s21 + $0x8] sm:$0xff]  ;;  %v621_v19 = vld [vmem:[%s2006_s21 + $0x10] sm:$0xff] }
  0x22   : > { %v619_v7 = vld [vmem:[%s2006_s21] sm:$0xff] }
  0x23   : > { %698 = vmatpush.msra.mxu1 %v616_v20  ;;  %1631 = vmatpush.msra.mxu3 %v616_v20 }
  0x24   : > { %1593 = vmatmul.msk.f32.gmra.mxu0 %vm485_vm1, %v465_v3  ;;  %1602 = vmatmul.msk.f32.gmra.mxu2 %vm485_vm1, %v474_v9 }
  0x25   : > { %699 = vmatpush.msra.mxu1 %v615_v21  ;;  %1632 = vmatpush.msra.mxu3 %v615_v21 }
  0x2c   : > { %1594 = vmatmul.msk.f32.gmra.mxu0 %vm485_vm1, %v466_v4  ;;  %1603 = vmatmul.msk.f32.gmra.mxu2 %vm485_vm1, %v475_v11 }
  0x34   : > { %1595 = vmatmul.msk.f32.gmra.mxu0 %vm485_vm1, %v467_v5  ;;  %1604 = vmatmul.msk.f32.gmra.mxu2 %vm485_vm1, %v476_v14 }
  0x3c   : > { %1596 = vmatmul.msk.f32.gmra.mxu0 %vm485_vm1, %v468_v6  ;;  %1605 = vmatmul.msk.f32.gmra.mxu2 %vm485_vm1, %v477_v16 }
  0x44   : > { %1597 = vmatmul.msk.f32.gmra.mxu0 %vm485_vm1, %v469_v8  ;;  %1606 = vmatmul.msk.f32.gmra.mxu2 %vm485_vm1, %v478_v17 }
  0x4c   : > { %1598 = vmatmul.msk.f32.gmra.mxu0 %vm485_vm1, %v470_v10  ;;  %1607 = vmatmul.msk.f32.gmra.mxu2 %vm485_vm1, %v479_v18 }
  0x54   : > { %1599 = vmatmul.msk.f32.gmra.mxu0 %vm485_vm1, %v471_v13 }
  0x5c   : > { %1600 = vmatmul.msk.f32.gmra.mxu0 %vm485_vm1, %v472_v15 }
  0x99   : > { %v551_v23 = vpop.f32.mrf.mxu0 }
  0x9a   : > { %v552_v24 = vadd.f32 %v2070_v22, %v551_v23 }
  0x9c   : > { %v599_v25 = vmax.f32 %v552_v24, 0.0 }
  0x9e   : > { %1608 = vmatmul.msk.f32.vlgmr.msra.gmra.mxu1 %vm635_vm2, %v599_v25 }
  0x9f   : > { %v578_v44 = vpop.f32.mrf.mxu2 }
  0xa0   : > { %v579_v52 = vadd.f32 %v2070_v22, %v578_v44 }
  0xa1   : > { %v554_v26 = vpop.f32.mrf.mxu0 }
  0xa2   : > { %v555_v27 = vadd.f32 %v2070_v22, %v554_v26  ;;  %v608_v53 = vmax.f32 %v579_v52, 0.0 }
  0xa4   : > { %v600_v28 = vmax.f32 %v555_v27, 0.0  ;;  %v622_v27 = vld [vmem:[%s2006_s21 + $0x18] sm:$0xff] }
  0xa6   : > { %1609 = vmatmul.msk.f32.gmra.mxu1 %vm635_vm2, %v600_v28  ;;  %v414_v28 = vlaneseq }
  0xa7   : > { %v581_v49 = vpop.f32.mrf.mxu2 }
  0xa8   : > { %v582_v55 = vadd.f32 %v2070_v22, %v581_v49 }
  0xa9   : > { %v557_v29 = vpop.f32.mrf.mxu0 }
  0xaa   : > { %v558_v30 = vadd.f32 %v2070_v22, %v557_v29  ;;  %v609_v56 = vmax.f32 %v582_v55, 0.0 }
  0xac   : > { %v601_v31 = vmax.f32 %v558_v30, 0.0 }
  0xae   : > { %1610 = vmatmul.msk.f32.gmra.mxu1 %vm635_vm2, %v601_v31 }
  0xaf   : > { %v584_v54 = vpop.f32.mrf.mxu2 }
  0xb0   : > { %v585_v58 = vadd.f32 %v2070_v22, %v584_v54 }
  0xb1   : > { %v560_v32 = vpop.f32.mrf.mxu0 }
  0xb2   : > { %v561_v33 = vadd.f32 %v2070_v22, %v560_v32  ;;  %v610_v59 = vmax.f32 %v585_v58, 0.0  ;;  %v1909_v32 = vmov 0  }
  0xb3   : > { %1679 = vset.pattern.permute.xlu0 %v1909_v32  ;;  %1680 = vset.pattern.permute.xlu2 %v1909_v32 }
  0xb4   : > { %v602_v34 = vmax.f32 %v561_v33, 0.0  ;;  %1681 = vset.pattern.permute.xlu1 %v1909_v32 }
  0xb6   : > { %1611 = vmatmul.msk.f32.gmra.mxu1 %vm635_vm2, %v602_v34  ;;  %v2112_v34 = vshrl.u32 %v414_v28, 7 }
  0xb7   : > { %v587_v57 = vpop.f32.mrf.mxu2 }
  0xb8   : > { %v588_v60 = vadd.f32 %v2070_v22, %v587_v57 }
  0xb9   : > { %v563_v35 = vpop.f32.mrf.mxu0 }
  0xba   : > { %v564_v36 = vadd.f32 %v2070_v22, %v563_v35  ;;  %v611_v62 = vmax.f32 %v588_v60, 0.0 }
  0xbc   : > { %v603_v37 = vmax.f32 %v564_v36, 0.0  ;;  %v2114_v36 = vstv %s1591_s13 }
  0xbe   : > { %1612 = vmatmul.msk.f32.gmra.mxu1 %vm635_vm2, %v603_v37 }
  0xbf   : > { %v590_v61 = vpop.f32.mrf.mxu2 }
  0xc0   : > { %v591_v63 = vadd.f32 %v2070_v22, %v590_v61 }
  0xc1   : > { %v566_v38 = vpop.f32.mrf.mxu0 }
  0xc2   : > { %v567_v39 = vadd.f32 %v2070_v22, %v566_v38  ;;  %v612_v1 = vmax.f32 %v591_v63, 0.0 }
  0xc4   : > { %v604_v40 = vmax.f32 %v567_v39, 0.0 }
  0xc6   : > { %1613 = vmatmul.msk.f32.gmra.mxu1 %vm635_vm2, %v604_v40 }
  0xc7   : > { %v593_v0 = vpop.f32.mrf.mxu2 }
  0xc8   : > { %v594_v2 = vadd.f32 %v2070_v22, %v593_v0 }
  0xc9   : > { %v569_v41 = vpop.f32.mrf.mxu0 }
  0xca   : > { %v570_v42 = vadd.f32 %v2070_v22, %v569_v41  ;;  %v613_v3 = vmax.f32 %v594_v2, 0.0  ;;  %v624_v2 = vld [vmem:[%s2006_s21 + $0x28] sm:$0xff] }
  0xcc   : > { %v605_v43 = vmax.f32 %v570_v42, 0.0 }
  0xce   : > { %1614 = vmatmul.msk.f32.gmra.mxu1 %vm635_vm2, %v605_v43 }
  0xcf   : > { %v596_v4 = vpop.f32.mrf.mxu2 }
  0xd0   : > { %v597_v5 = vadd.f32 %v2070_v22, %v596_v4 }
  0xd1   : > { %v572_v45 = vpop.f32.mrf.mxu0 }
  0xd2   : > { %v573_v46 = vadd.f32 %v2070_v22, %v572_v45  ;;  %v614_v6 = vmax.f32 %v597_v5, 0.0  ;;  %v623_v45 = vld [vmem:[%s2006_s21 + $0x20] sm:$0xff] }
  0xd4   : > { %v606_v47 = vmax.f32 %v573_v46, 0.0  ;;  %v416_v46 = vadd.s32 8, %v2112_v34 }
  0xd6   : > { %1615 = vmatmul.msk.f32.gmra.mxu1 %vm635_vm2, %v606_v47  ;;  %v432_v47 = vadd.s32 %v2114_v36, %v2112_v34  ;;  %v433_v54 = vadd.s32 %v2114_v36, %v416_v46 }
  0xd8   : > { %vm448_vm7 = vcmp.lt.s32.totalorder %v432_v47, 300  ;;  %vm449_vm10 = vcmp.lt.s32.totalorder %v433_v54, 300 }
  0xd9   : > { %v575_v48 = vpop.f32.mrf.mxu0 }
  0xda   : > { %v576_v50 = vadd.f32 %v2070_v22, %v575_v48 }
  0xdc   : > { %v607_v51 = vmax.f32 %v576_v50, 0.0 }
  0xde   : > { %1616 = vmatmul.msk.f32.vlgmr.msra.gmra.mxu3 %vm635_vm2, %v607_v51 }
  0xe6   : > { %1617 = vmatmul.msk.f32.gmra.mxu3 %vm635_vm2, %v608_v53 }
  0xee   : > { %1618 = vmatmul.msk.f32.gmra.mxu3 %vm635_vm2, %v609_v56 }
  0xf6   : > { %1619 = vmatmul.msk.f32.gmra.mxu3 %vm635_vm2, %v610_v59 }
  0xfe   : > { %1620 = vmatmul.msk.f32.gmra.mxu3 %vm635_vm2, %v611_v62 }
 0x106   : > { %1621 = vmatmul.msk.f32.gmra.mxu3 %vm635_vm2, %v612_v1 }
 0x10e   : > { %1622 = vmatmul.msk.f32.gmra.mxu3 %vm635_vm2, %v613_v3 }
 0x116   : > { %1623 = vmatmul.msk.f32.gmra.mxu3 %vm635_vm2, %v614_v6 }
 0x11b   : > { %v701_v8 = vpop.f32.mrf.mxu1 }
 0x11c   : > { %v702_v9 = vadd.f32 %v701_v8, %v619_v7 }
 0x11e   : > { %v749_v10 = vsub.f32 0.0, %v702_v9 }
 0x120   : > { %v765_v11 = vmul.f32 1.442695, %v749_v10 }
 0x122   : > { %1804 = vpow2.f32 %v765_v11 }
 0x123   : > { %v704_v13 = vpop.f32.mrf.mxu1 }
 0x124   : > { %v705_v14 = vadd.f32 %v704_v13, %v620_v12  ;;  %v417_v12 = vadd.s32 16, %v2112_v34 }
 0x126   : > { %v750_v15 = vsub.f32 0.0, %v705_v14 }
 0x128   : > { %v1805_v16 = vpop.eup %1804  ;;  %v767_v17 = vmul.f32 1.442695, %v750_v15 }
 0x129   : > { %v797_v18 = vadd.f32 1.0, %v1805_v16 }
 0x12a   : > { %1806 = vpow2.f32 %v767_v17 }
 0x12b   : > { %1808 = vrcp.f32 %v797_v18  ;;  %v707_v20 = vpop.f32.mrf.mxu1  ;;  %v824_v38 = vand.u32 2147483648, %v797_v18  ;;  %vm818_vm4 = vweird.f32 %v797_v18  ;;  %v822_v42 = vand.u32 2147483647, %v797_v18 }
 0x12c   : > { %v708_v21 = vadd.f32 %v707_v20, %v621_v19 }
 0x12d   : > { %v825_v51 = vor.u32 1.1754944e-38, %v824_v38  ;;  %vm823_vm6 = vcmp.eq.f32.partialorder %v822_v42, 8.507059e+37 }
 0x12e   : > { %v751_v22 = vsub.f32 0.0, %v708_v21 }
 0x130   : > { %v1807_v23 = vpop.eup %1806  ;;  %v769_v24 = vmul.f32 1.442695, %v751_v22 }
 0x131   : > { %v1809_v25 = vpop.eup %1808  ;;  %v2107_v26 = vadd.f32 1.0, %v1807_v23 }
 0x132   : > { %1810 = vpow2.f32 %v769_v24  ;;  %v814_v29 = vmul.f32 %v1809_v25, %v797_v18  ;;  %vm819_vm3 = vweird.f32 %v1809_v25 }
 0x133   : > { %1812 = vrcp.f32 %v2107_v26  ;;  %v710_v30 = vpop.f32.mrf.mxu1  ;;  %vm820_vm5 = vmor %vm818_vm4, %vm819_vm3  ;;  %v838_v58 = vand.u32 2147483648, %v2107_v26  ;;  %v836_v59 = vand.u32 2147483647, %v2107_v26  ;;  %vm832_vm9 = vweird.f32 %v2107_v26 }
 0x134   : > { %v711_v31 = vadd.f32 %v710_v30, %v622_v27  ;;  %v815_v33 = vsub.f32 1.0, %v814_v29  ;;  %v434_v27 = vadd.s32 %v2114_v36, %v417_v12 }
 0x135   : > { %v839_v4 = vor.u32 1.1754944e-38, %v838_v58  ;;  %vm837_vm12 = vcmp.eq.f32.partialorder %v836_v59, 8.507059e+37 }
 0x136   : > { %v752_v35 = vsub.f32 0.0, %v711_v31  ;;  %v816_v37 = vmul.f32 %v1809_v25, %v815_v33  ;;  %vm450_vm1 = vcmp.lt.s32.totalorder %v434_v27, 300  ;;  %v627_v27 = vld [vmem:[%s2006_s21 + $0x40] sm:$0xff] }
 0x138   : > { %v1811_v39 = vpop.eup %1810  ;;  %v771_v40 = vmul.f32 1.442695, %v752_v35  ;;  %v817_v41 = vadd.f32 %v1809_v25, %v816_v37 }
 0x139   : > { %v1813_v43 = vpop.eup %1812  ;;  %v2116_v44 = vadd.f32 1.0, %v1811_v39 }
 0x13a   : > { %1814 = vpow2.f32 %v771_v40  ;;  %v828_v48 = vmul.f32 %v1813_v43, %v2107_v26  ;;  %v821_v49 = vsel %vm820_vm5, %v1809_v25, %v817_v41  ;;  %vm833_vm8 = vweird.f32 %v1813_v43  ;;  %v625_v25 = vld [vmem:[%s2006_s21 + $0x30] sm:$0xff] }
 0x13b   : > { %1816 = vrcp.f32 %v2116_v44  ;;  %v713_v50 = vpop.f32.mrf.mxu1  ;;  %v826_v55 = vsel %vm823_vm6, %v825_v51, %v821_v49  ;;  %vm834_vm11 = vmor %vm832_vm9, %vm833_vm8  ;;  %v850_v16 = vand.u32 2147483647, %v2116_v44  ;;  %v852_v17 = vand.u32 2147483648, %v2116_v44  ;;  %v626_v49 = vld [vmem:[%s2006_s21 + $0x38] sm:$0xff] }
 0x13c   : > { %v714_v52 = vadd.f32 %v713_v50, %v623_v45  ;;  %v829_v53 = vsub.f32 1.0, %v828_v48  ;;  %v2129_v63 = vsel %vm448_vm7, %v826_v55, 0.0  ;;  %v418_v26 = vadd.s32 24, %v2112_v34 }
 0x13d   : > { %v1053_v7 = vsub.f32 1.0, %v2129_v63  ;;  %vm846_vm14 = vweird.f32 %v2116_v44  ;;  %v853_v31 = vor.u32 1.1754944e-38, %v852_v17  ;;  %vm851_vm0 = vcmp.eq.f32.partialorder %v850_v16, 8.507059e+37 }
 0x13e   : > { %v753_v56 = vsub.f32 0.0, %v714_v52  ;;  %v830_v57 = vmul.f32 %v1813_v43, %v829_v53  ;;  %v435_v37 = vadd.s32 %v2114_v36, %v418_v26  ;;  %v419_v51 = vadd.s32 32, %v2112_v34 }
 0x13f   : > { %v2145_v18 = vsel %vm448_vm7, %v1053_v7, 0.0 }
 0x140   : > { %v1815_v60 = vpop.eup %1814  ;;  %v773_v61 = vmul.f32 1.442695, %v753_v56  ;;  %v831_v62 = vadd.f32 %v1813_v43, %v830_v57  ;;  %vm451_vm5 = vcmp.lt.s32.totalorder %v435_v37, 300  ;;  %v421_v37 = vadd.s32 48, %v2112_v34 }
 0x141   : > { %v1817_v0 = vpop.eup %1816  ;;  %v2131_v1 = vadd.f32 1.0, %v1815_v60 }
 0x142   : > { %1818 = vpow2.f32 %v773_v61  ;;  %v835_v3 = vsel %vm834_vm11, %v1813_v43, %v831_v62  ;;  %v842_v5 = vmul.f32 %v1817_v0, %v2116_v44  ;;  %vm847_vm13 = vweird.f32 %v1817_v0 }
 0x143   : > { %1820 = vrcp.f32 %v2131_v1  ;;  %v716_v6 = vpop.f32.mrf.mxu1  ;;  %v840_v9 = vsel %vm837_vm12, %v839_v4, %v835_v3  ;;  %vm848_vm15 = vmor %vm846_vm14, %vm847_vm13  ;;  %v866_v38 = vand.u32 2147483648, %v2131_v1  ;;  %v864_v42 = vand.u32 2147483647, %v2131_v1 }
 0x144   : > { %v717_v8 = vadd.f32 %v716_v6, %v624_v2  ;;  %v843_v10 = vsub.f32 1.0, %v842_v5  ;;  %v2138_v11 = vsel %vm449_vm10, %v840_v9, 0.0  ;;  %vm860_vm4 = vweird.f32 %v2131_v1 }
 0x145   : > { %v1054_v14 = vsub.f32 1.0, %v2138_v11  ;;  %v867_v50 = vor.u32 1.1754944e-38, %v866_v38  ;;  %vm865_vm7 = vcmp.eq.f32.partialorder %v864_v42, 8.507059e+37  ;;  %v436_v61 = vadd.s32 %v2114_v36, %v419_v51 }
 0x146   : > { %v754_v13 = vsub.f32 0.0, %v717_v8  ;;  %v844_v15 = vmul.f32 %v1817_v0, %v843_v10 }
 0x147   : > { %v2148_v21 = vsel %vm449_vm10, %v1054_v14, 0.0  ;;  %vm452_vm10 = vcmp.lt.s32.totalorder %v436_v61, 300  ;;  %v422_v61 = vadd.s32 56, %v2112_v34 }
 0x148   : > { %v1819_v19 = vpop.eup %1818  ;;  %v775_v20 = vmul.f32 1.442695, %v754_v13  ;;  %v845_v22 = vadd.f32 %v1817_v0, %v844_v15  ;;  %v1797_v28 = vpack.i.bf16 %v2145_v18, %v2148_v21  ;;  %v420_v13 = vadd.s32 40, %v2112_v34 }
 0x149   : > { %v1821_v23 = vpop.eup %1820  ;;  %v2150_v24 = vadd.f32 1.0, %v1819_v19 }
 0x14a   : > { %1822 = vpow2.f32 %v775_v20  ;;  %v856_v29 = vmul.f32 %v1821_v23, %v2131_v1  ;;  %v849_v35 = vsel %vm848_vm15, %v1817_v0, %v845_v22  ;;  %vm861_vm3 = vweird.f32 %v1821_v23 }
 0x14b   : > { %1824 = vrcp.f32 %v2150_v24  ;;  %v719_v30 = vpop.f32.mrf.mxu1  ;;  %v854_v39 = vsel %vm851_vm0, %v853_v31, %v849_v35  ;;  %vm862_vm6 = vmor %vm860_vm4, %vm861_vm3  ;;  %v880_v62 = vand.u32 2147483648, %v2150_v24  ;;  %v878_v2 = vand.u32 2147483647, %v2150_v24 }
 0x14c   : > { %v720_v32 = vadd.f32 %v719_v30, %v625_v25  ;;  %v857_v33 = vsub.f32 1.0, %v856_v29  ;;  %v2165_v46 = vsel %vm450_vm1, %v854_v39, 0.0  ;;  %vm874_vm9 = vweird.f32 %v2150_v24 }
 0x14d   : > { %v1055_v56 = vsub.f32 1.0, %v2165_v46  ;;  %v881_v12 = vor.u32 1.1754944e-38, %v880_v62  ;;  %vm879_vm12 = vcmp.eq.f32.partialorder %v878_v2, 8.507059e+37  ;;  %v437_v22 = vadd.s32 %v2114_v36, %v420_v13 }
 0x14e   : > { %v755_v40 = vsub.f32 0.0, %v720_v32  ;;  %v858_v41 = vmul.f32 %v1821_v23, %v857_v33 }
 0x14f   : > { %v2186_v4 = vsel %vm450_vm1, %v1055_v56, 0.0  ;;  %vm453_vm15 = vcmp.lt.s32.totalorder %v437_v22, 300  ;;  %v629_v22 = vld [vmem:[%s2006_s21 + $0x50] sm:$0xff] }
 0x150   : > { %v1823_v43 = vpop.eup %1822  ;;  %v777_v44 = vmul.f32 1.442695, %v755_v40  ;;  %v859_v45 = vadd.f32 %v1821_v23, %v858_v41 }
 0x151   : > { %v1825_v47 = vpop.eup %1824  ;;  %v2167_v48 = vadd.f32 1.0, %v1823_v43 }
 0x152   : > { %1826 = vpow2.f32 %v777_v44  ;;  %v863_v52 = vsel %vm862_vm6, %v1821_v23, %v859_v45  ;;  %v870_v53 = vmul.f32 %v1825_v47, %v2150_v24  ;;  %vm875_vm8 = vweird.f32 %v1825_v47 }
 0x153   : > { %1828 = vrcp.f32 %v2167_v48  ;;  %v722_v54 = vpop.f32.mrf.mxu1  ;;  %v868_v55 = vsel %vm865_vm7, %v867_v50, %v863_v52  ;;  %vm876_vm11 = vmor %vm874_vm9, %vm875_vm8  ;;  %v894_v23 = vand.u32 2147483648, %v2167_v48  ;;  %v892_v25 = vand.u32 2147483647, %v2167_v48 }
 0x154   : > { %v723_v57 = vadd.f32 %v722_v54, %v626_v49  ;;  %v2175_v58 = vsel %vm451_vm5, %v868_v55, 0.0  ;;  %v871_v59 = vsub.f32 1.0, %v870_v53  ;;  %vm888_vm14 = vweird.f32 %v2167_v48  ;;  %v628_v54 = vld [vmem:[%s2006_s21 + $0x48] sm:$0xff] }
 0x155   : > { %1118 = vperm.xlu0 %1679, %v2175_v58   ;;  %v1056_v60 = vsub.f32 1.0, %v2175_v58  ;;  %v895_v35 = vor.u32 1.1754944e-38, %v894_v23  ;;  %vm893_vm1 = vcmp.eq.f32.partialorder %v892_v25, 8.507059e+37 }
 0x156   : > { %v756_v0 = vsub.f32 0.0, %v723_v57  ;;  %v872_v1 = vmul.f32 %v1825_v47, %v871_v59 }
 0x157   : > { %v2183_v3 = vsel %vm451_vm5, %v1056_v60, 0.0 }
 0x158   : > { %v1827_v5 = vpop.eup %1826  ;;  %v779_v6 = vmul.f32 1.442695, %v756_v0  ;;  %v873_v7 = vadd.f32 %v1825_v47, %v872_v1  ;;  %v1782_v8 = vpack.i.bf16 %v2186_v4, %v2183_v3 }
 0x159   : > { %v1829_v9 = vpop.eup %1828  ;;  %v2191_v10 = vadd.f32 1.0, %v1827_v5 }
 0x15a   : > { %1830 = vpow2.f32 %v779_v6  ;;  %v877_v14 = vsel %vm876_vm11, %v1825_v47, %v873_v7  ;;  %v884_v15 = vmul.f32 %v1829_v9, %v2167_v48  ;;  %vm889_vm13 = vweird.f32 %v1829_v9 }
 0x15b   : > { %1832 = vrcp.f32 %v2191_v10  ;;  %v882_v16 = vsel %vm879_vm12, %v881_v12, %v877_v14  ;;  %vm890_vm0 = vmor %vm888_vm14, %vm889_vm13  ;;  %v438_v47 = vadd.s32 %v2114_v36, %v421_v37  ;;  %v908_v48 = vand.u32 2147483648, %v2191_v10 }
 0x15c   : > { %v2197_v17 = vsel %vm452_vm10, %v882_v16, 0.0  ;;  %v885_v19 = vsub.f32 1.0, %v884_v15  ;;  %v906_v52 = vand.u32 2147483647, %v2191_v10  ;;  %vm902_vm4 = vweird.f32 %v2191_v10 }
 0x15d   : > { %1123 = vperm.xlu2 %1680, %v2197_v17   ;;  %v1057_v20 = vsub.f32 1.0, %v2197_v17  ;;  %vm454_vm5 = vcmp.lt.s32.totalorder %v438_v47, 300  ;;  %v909_v60 = vor.u32 1.1754944e-38, %v908_v48 }
 0x15e   : > { %v886_v24 = vmul.f32 %v1829_v9, %v885_v19  ;;  %vm907_vm7 = vcmp.eq.f32.partialorder %v906_v52, 8.507059e+37 }
 0x15f   : > { %v2205_v26 = vsel %vm452_vm10, %v1057_v20, 0.0 }
 0x160   : > { %v1831_v29 = vpop.eup %1830  ;;  %v887_v30 = vadd.f32 %v1829_v9, %v886_v24 }
 0x161   : > { %v1833_v31 = vpop.eup %1832  ;;  %v2209_v32 = vadd.f32 1.0, %v1831_v29  ;;  %v725_v33 = vpop.f32.mrf.mxu3 }
 0x162   : > { %v726_v38 = vadd.f32 %v725_v33, %v627_v27  ;;  %v891_v39 = vsel %vm890_vm0, %v1829_v9, %v887_v30  ;;  %v898_v40 = vmul.f32 %v1833_v31, %v2191_v10  ;;  %vm903_vm3 = vweird.f32 %v1833_v31 }
 0x163   : > { %1834 = vrcp.f32 %v2209_v32  ;;  %v896_v41 = vsel %vm893_vm1, %v895_v35, %v891_v39  ;;  %vm904_vm6 = vmor %vm902_vm4, %vm903_vm3  ;;  %v439_v10 = vadd.s32 %v2114_v36, %v422_v61  ;;  %v922_v12 = vand.u32 2147483648, %v2209_v32 }
 0x164   : > { %v757_v42 = vsub.f32 0.0, %v726_v38  ;;  %v2215_v43 = vsel %vm453_vm15, %v896_v41, 0.0  ;;  %v899_v44 = vsub.f32 1.0, %v898_v40  ;;  %v920_v16 = vand.u32 2147483647, %v2209_v32 }
 0x165   : > { %1128 = vperm.xlu1 %1681, %v2215_v43   ;;  %v1058_v45 = vsub.f32 1.0, %v2215_v43  ;;  %v1762_v49 = vpack.i.bf16 %v2197_v17, %v2215_v43  ;;  %vm916_vm9 = vweird.f32 %v2209_v32  ;;  %vm455_vm10 = vcmp.lt.s32.totalorder %v439_v10, 300 }
 0x166   : > { %v781_v50 = vmul.f32 1.442695, %v757_v42  ;;  %v900_v51 = vmul.f32 %v1833_v31, %v899_v44  ;;  %v923_v25 = vor.u32 1.1754944e-38, %v922_v12  ;;  %vm921_vm12 = vcmp.eq.f32.partialorder %v920_v16, 8.507059e+37  ;;  %v630_v42 = vld [vmem:[%s2006_s21 + $0x58] sm:$0xff] }
 0x167   : > { %v2225_v53 = vsel %vm453_vm15, %v1058_v45, 0.0  ;;  %v423_v44 = vadd.s32 64, %v2112_v34  ;;  %v1792_v43 = vpack.i.bf16 %v2129_v63, %v2138_v11 }
 0x168   : > { %1836 = vpow2.f32 %v781_v50  ;;  %v901_v55 = vadd.f32 %v1833_v31, %v900_v51  ;;  %v1767_v56 = vpack.i.bf16 %v2205_v26, %v2225_v53 }
 0x169   : > { %v1835_v57 = vpop.eup %1834  ;;  %v728_v59 = vpop.f32.mrf.mxu3  ;;  %v440_v52 = vadd.s32 %v2114_v36, %v423_v44  ;;  %v425_v44 = vadd.s32 80, %v2112_v34 }
 0x16a   : > { %v729_v62 = vadd.f32 %v728_v59, %v628_v54  ;;  %v905_v0 = vsel %vm904_vm6, %v1833_v31, %v901_v55  ;;  %v912_v1 = vmul.f32 %v1835_v57, %v2209_v32  ;;  %vm917_vm8 = vweird.f32 %v1835_v57 }
 0x16b   : > { %v910_v2 = vsel %vm907_vm7, %v909_v60, %v905_v0  ;;  %vm918_vm11 = vmor %vm916_vm9, %vm917_vm8  ;;  %vm456_vm15 = vcmp.lt.s32.totalorder %v440_v52, 300 }
 0x16c   : > { %v758_v5 = vsub.f32 0.0, %v729_v62  ;;  %v2234_v6 = vsel %vm454_vm5, %v910_v2, 0.0  ;;  %v913_v7 = vsub.f32 1.0, %v912_v1  ;;  %v631_v2 = vld [vmem:[%s2006_s21 + $0x60] sm:$0xff] }
 0x16d   : > { %v1059_v9 = vsub.f32 1.0, %v2234_v6  ;;  %1133 = vperm.xlu0 %1679, %v2234_v6  }
 0x16e   : > { %v1837_v13 = vpop.eup %1836  ;;  %v783_v14 = vmul.f32 1.442695, %v758_v5  ;;  %v914_v15 = vmul.f32 %v1835_v57, %v913_v7  ;;  %v424_v7 = vadd.s32 72, %v2112_v34 }
 0x16f   : > { %v805_v19 = vadd.f32 1.0, %v1837_v13  ;;  %v2242_v20 = vsel %vm454_vm5, %v1059_v9, 0.0 }
 0x170   : > { %1838 = vpow2.f32 %v783_v14  ;;  %v915_v23 = vadd.f32 %v1835_v57, %v914_v15 }
 0x171   : > { %1840 = vrcp.f32 %v805_v19  ;;  %v731_v24 = vpop.f32.mrf.mxu3  ;;  %v936_v54 = vand.u32 2147483648, %v805_v19  ;;  %v934_v59 = vand.u32 2147483647, %v805_v19  ;;  %vm930_vm14 = vweird.f32 %v805_v19 }
 0x172   : > { %v732_v27 = vadd.f32 %v731_v24, %v629_v22  ;;  %v919_v29 = vsel %vm918_vm11, %v1835_v57, %v915_v23  ;;  %v441_v22 = vadd.s32 %v2114_v36, %v424_v7 }
 0x173   : > { %v924_v30 = vsel %vm921_vm12, %v923_v25, %v919_v29  ;;  %v937_v5 = vor.u32 1.1754944e-38, %v936_v54  ;;  %vm935_vm1 = vcmp.eq.f32.partialorder %v934_v59, 8.507059e+37 }
 0x174   : > { %v759_v31 = vsub.f32 0.0, %v732_v27  ;;  %v2247_v33 = vsel %vm455_vm10, %v924_v30, 0.0  ;;  %vm457_vm5 = vcmp.lt.s32.totalorder %v441_v22, 300 }
 0x175   : > { %v1060_v35 = vsub.f32 1.0, %v2247_v33  ;;  %1138 = vperm.xlu2 %1680, %v2247_v33   ;;  %v1747_v32 = vpack.i.bf16 %v2234_v6, %v2247_v33  ;;  %v1777_v6 = vpack.i.bf16 %v2165_v46, %v2175_v58 }
 0x176   : > { %v1839_v37 = vpop.eup %1838  ;;  %v785_v38 = vmul.f32 1.442695, %v759_v31 }
 0x177   : > { %v1841_v39 = vpop.eup %1840  ;;  %v806_v40 = vadd.f32 1.0, %v1839_v37  ;;  %v2254_v41 = vsel %vm455_vm10, %v1060_v35, 0.0 }
 0x178   : > { %1842 = vpow2.f32 %v785_v38  ;;  %v926_v45 = vmul.f32 %v1841_v39, %v805_v19  ;;  %v1752_v51 = vpack.i.bf16 %v2242_v20, %v2254_v41  ;;  %vm931_vm13 = vweird.f32 %v1841_v39  ;;  %v1094_v20 = vld [vmem:[%s2011_s8 + $0x48] sm:$0xff] }
 0x179   : > { %1844 = vrcp.f32 %v806_v40  ;;  %v734_v47 = vpop.f32.mrf.mxu3  ;;  %vm932_vm0 = vmor %vm930_vm14, %vm931_vm13  ;;  %v950_v23 = vand.u32 2147483648, %v806_v40  ;;  %v948_v27 = vand.u32 2147483647, %v806_v40  ;;  %vm944_vm4 = vweird.f32 %v806_v40 }
 0x17a   : > { %v735_v48 = vadd.f32 %v734_v47, %v630_v42  ;;  %v927_v50 = vsub.f32 1.0, %v926_v45 }
 0x17b   : > { %v951_v42 = vor.u32 1.1754944e-38, %v950_v23  ;;  %vm949_vm7 = vcmp.eq.f32.partialorder %v948_v27, 8.507059e+37 }
 0x17c   : > { %v760_v55 = vsub.f32 0.0, %v735_v48  ;;  %v928_v57 = vmul.f32 %v1841_v39, %v927_v50 }
 0x17e   : > { %v1843_v60 = vpop.eup %1842  ;;  %v787_v61 = vmul.f32 1.442695, %v760_v55  ;;  %v929_v62 = vadd.f32 %v1841_v39, %v928_v57  ;;  %v2287_v57 = vadd.s32 %v2114_v36, %v425_v44 }
 0x17f   : > { %v1845_v0 = vpop.eup %1844  ;;  %v2261_v1 = vadd.f32 1.0, %v1843_v60 }
 0x180   : > { %1846 = vpow2.f32 %v787_v61  ;;  %v933_v9 = vsel %vm932_vm0, %v1841_v39, %v929_v62  ;;  %v940_v10 = vmul.f32 %v1845_v0, %v806_v40  ;;  %vm945_vm3 = vweird.f32 %v1845_v0  ;;  %v632_v39 = vld [vmem:[%s2006_s21 + $0x68] sm:$0xff] }
 0x181   : > { %1848 = vrcp.f32 %v2261_v1  ;;  %v737_v12 = vpop.f32.mrf.mxu3  ;;  %v938_v13 = vsel %vm935_vm1, %v937_v5, %v933_v9  ;;  %vm946_vm6 = vmor %vm944_vm4, %vm945_vm3  ;;  %v964_v59 = vand.u32 2147483648, %v2261_v1  ;;  %v962_v62 = vand.u32 2147483647, %v2261_v1 }
 0x182   : > { %v738_v14 = vadd.f32 %v737_v12, %v631_v2  ;;  %v2267_v15 = vsel %vm456_vm15, %v938_v13, 0.0  ;;  %v941_v16 = vsub.f32 1.0, %v940_v10  ;;  %vm958_vm9 = vweird.f32 %v2261_v1  ;;  %v633_v13 = vld [vmem:[%s2006_s21 + $0x70] sm:$0xff] }
 0x183   : > { %v1061_v19 = vsub.f32 1.0, %v2267_v15  ;;  %1143 = vperm.xlu1 %1681, %v2267_v15   ;;  %vm458_vm10 = vcmp.lt.s32.totalorder %v2287_v57, 300  ;;  %vm963_vm12 = vcmp.eq.f32.partialorder %v962_v62, 8.507059e+37 }
 0x184   : > { %v761_v24 = vsub.f32 0.0, %v738_v14  ;;  %v942_v25 = vmul.f32 %v1845_v0, %v941_v16  ;;  %v965_v14 = vor.u32 1.1754944e-38, %v964_v59  ;;  %v426_v16 = vadd.s32 88, %v2112_v34 }
 0x185   : > { %v2273_v29 = vsel %vm456_vm15, %v1061_v19, 0.0 }
 0x186   : > { %v1847_v30 = vpop.eup %1846  ;;  %v789_v31 = vmul.f32 1.442695, %v761_v24  ;;  %v943_v35 = vadd.f32 %v1845_v0, %v942_v25 }
 0x187   : > { %v1849_v37 = vpop.eup %1848  ;;  %v2275_v38 = vadd.f32 1.0, %v1847_v30  ;;  %v2310_v30 = vadd.s32 %v2114_v36, %v426_v16 }
 0x188   : > { %1850 = vpow2.f32 %v789_v31  ;;  %v947_v45 = vsel %vm946_vm6, %v1845_v0, %v943_v35  ;;  %v954_v47 = vmul.f32 %v1849_v37, %v2261_v1  ;;  %vm959_vm8 = vweird.f32 %v1849_v37 }
 0x189   : > { %1852 = vrcp.f32 %v2275_v38  ;;  %v740_v48 = vpop.f32.mrf.mxu3  ;;  %v952_v50 = vsel %vm949_vm7, %v951_v42, %v947_v45  ;;  %vm960_vm11 = vmor %vm958_vm9, %vm959_vm8  ;;  %v978_v31 = vand.u32 2147483648, %v2275_v38  ;;  %vm972_vm14 = vweird.f32 %v2275_v38 }
 0x18a   : > { %v741_v52 = vadd.f32 %v740_v48, %v632_v39  ;;  %v2282_v40 = vsel %vm457_vm5, %v952_v50, 0.0  ;;  %v955_v54 = vsub.f32 1.0, %v954_v47  ;;  %v976_v39 = vand.u32 2147483647, %v2275_v38  ;;  %v634_v50 = vld [vmem:[%s2006_s21 + $0x78] sm:$0xff]  ;;  %s1911_s21 = smov 65  }
 0x18b   : > { %v1062_v55 = vsub.f32 1.0, %v2282_v40  ;;  %1148 = vperm.xlu0 %1679, %v2282_v40   ;;  %vm459_vm15 = vcmp.lt.s32.totalorder %v2310_v30, 300 }
 0x18c   : > { %v762_v60 = vsub.f32 0.0, %v741_v52  ;;  %v956_v61 = vmul.f32 %v1849_v37, %v955_v54  ;;  %v979_v52 = vor.u32 1.1754944e-38, %v978_v31  ;;  %v427_v54 = vadd.s32 96, %v2112_v34 }
 0x18d   : > { %v2292_v0 = vsel %vm457_vm5, %v1062_v55, 0.0  ;;  %vm977_vm1 = vcmp.eq.f32.partialorder %v976_v39, 8.507059e+37 }
 0x18e   : > { %v1851_v2 = vpop.eup %1850  ;;  %v791_v5 = vmul.f32 1.442695, %v762_v60  ;;  %v957_v7 = vadd.f32 %v1849_v37, %v956_v61  ;;  %v1707_v9 = vpack.i.bf16 %v2273_v29, %v2292_v0  ;;  %v1093_v0 = vld [vmem:[%s2011_s8 + $0x40] sm:$0xff] }
 0x18f   : > { %v1853_v10 = vpop.eup %1852  ;;  %v2297_v12 = vadd.f32 1.0, %v1851_v2 }
 0x190   : > { %1854 = vpow2.f32 %v791_v5  ;;  %v961_v19 = vsel %vm960_vm11, %v1849_v37, %v957_v7  ;;  %v968_v22 = vmul.f32 %v1853_v10, %v2275_v38  ;;  %vm973_vm13 = vweird.f32 %v1853_v10 }
 0x191   : > { %1856 = vrcp.f32 %v2297_v12  ;;  %v743_v1 = vpop.f32.mrf.mxu3  ;;  %v966_v23 = vsel %vm963_vm12, %v965_v14, %v961_v19  ;;  %vm974_vm0 = vmor %vm972_vm14, %vm973_vm13  ;;  %v2325_v5 = vadd.s32 %v2114_v36, %v427_v54  ;;  %v992_v7 = vand.u32 2147483648, %v2297_v12 }
 0x192   : > { %v744_v24 = vadd.f32 %v743_v1, %v633_v13  ;;  %v2306_v25 = vsel %vm458_vm10, %v966_v23, 0.0  ;;  %v969_v27 = vsub.f32 1.0, %v968_v22  ;;  %v990_v14 = vand.u32 2147483647, %v2297_v12 }
 0x193   : > { %1153 = vperm.xlu2 %1680, %v2306_v25   ;;  %vm986_vm4 = vweird.f32 %v2297_v12  ;;  %vm460_vm5 = vcmp.lt.s32.totalorder %v2325_v5, 300 }
 0x194   : > { %v763_v35 = vsub.f32 0.0, %v744_v24  ;;  %v970_v37 = vmul.f32 %v1853_v10, %v969_v27  ;;  %v993_v24 = vor.u32 1.1754944e-38, %v992_v7  ;;  %v428_v27 = vadd.s32 104, %v2112_v34 }
 0x195   : > { %vm991_vm7 = vcmp.eq.f32.partialorder %v990_v14, 8.507059e+37 }
 0x196   : > { %v1855_v42 = vpop.eup %1854  ;;  %v793_v44 = vmul.f32 1.442695, %v763_v35  ;;  %v971_v45 = vadd.f32 %v1853_v10, %v970_v37 }
 0x197   : > { %v1857_v47 = vpop.eup %1856  ;;  %v810_v48 = vadd.f32 1.0, %v1855_v42 }
 0x198   : > { %1858 = vpow2.f32 %v793_v44  ;;  %v975_v55 = vsel %vm974_vm0, %v1853_v10, %v971_v45  ;;  %v982_v59 = vmul.f32 %v1857_v47, %v2297_v12  ;;  %vm987_vm3 = vweird.f32 %v1857_v47 }
 0x199   : > { %1860 = vrcp.f32 %v810_v48  ;;  %v746_v60 = vpop.f32.mrf.mxu3  ;;  %v980_v61 = vsel %vm977_vm1, %v979_v52, %v975_v55  ;;  %vm988_vm6 = vmor %vm986_vm4, %vm987_vm3  ;;  %v2339_v12 = vadd.s32 %v2114_v36, %v428_v27  ;;  %v1006_v44 = vand.u32 2147483648, %v810_v48 }
 0x19a   : > { %v747_v62 = vadd.f32 %v746_v60, %v634_v50  ;;  %v2321_v38 = vsel %vm459_vm15, %v980_v61, 0.0  ;;  %v983_v2 = vsub.f32 1.0, %v982_v59  ;;  %vm1000_vm9 = vweird.f32 %v810_v48 }
 0x19b   : > { %1158 = vperm.xlu2 %1680, %v2321_v38   ;;  %vm461_vm11 = vcmp.lt.s32.totalorder %v2339_v12, 300  ;;  %v1007_v59 = vor.u32 1.1754944e-38, %v1006_v44  ;;  %v429_v60 = vadd.s32 112, %v2112_v34  ;;  %v430_v27 = vadd.s32 120, %v2112_v34 }
 0x19c   : > { %v764_v10 = vsub.f32 0.0, %v747_v62  ;;  %v984_v13 = vmul.f32 %v1857_v47, %v983_v2 }
 0x19e   : > { %v1859_v16 = vpop.eup %1858  ;;  %v795_v19 = vmul.f32 1.442695, %v764_v10  ;;  %v985_v22 = vadd.f32 %v1857_v47, %v984_v13  ;;  %v2347_v13 = vadd.s32 %v2114_v36, %v429_v60 }
 0x19f   : > { %v1861_v1 = vpop.eup %1860  ;;  %v811_v23 = vadd.f32 1.0, %v1859_v16 }
 0x1a0   : > { %1862 = vpow2.f32 %v795_v19  ;;  %v989_v31 = vsel %vm988_vm6, %v1857_v47, %v985_v22  ;;  %v996_v35 = vmul.f32 %v1861_v1, %v810_v48  ;;  %vm1001_vm8 = vweird.f32 %v1861_v1 }
 0x1a1   : > { %1864 = vrcp.f32 %v811_v23  ;;  %v994_v37 = vsel %vm991_vm7, %v993_v24, %v989_v31  ;;  %v1004_v47 = vand.u32 2147483647, %v810_v48  ;;  %vm1002_vm12 = vmor %vm1000_vm9, %vm1001_vm8  ;;  %v1020_v14 = vand.u32 2147483648, %v811_v23 }
 0x1a2   : > { %v2334_v39 = vsel %vm460_vm5, %v994_v37, 0.0  ;;  %v997_v42 = vsub.f32 1.0, %v996_v35  ;;  %v1018_v19 = vand.u32 2147483647, %v811_v23  ;;  %vm1014_vm0 = vweird.f32 %v811_v23 }
 0x1a3   : > { %1163 = vperm.xlu1 %1681, %v2334_v39   ;;  %1108 = vperm.xlu2 %1680, %v2138_v11   ;;  %vm1005_vm13 = vcmp.eq.f32.partialorder %v1004_v47, 8.507059e+37  ;;  %vm462_vm1 = vcmp.lt.s32.totalorder %v2347_v13, 300  ;;  %v1021_v24 = vor.u32 1.1754944e-38, %v1020_v14 }
 0x1a4   : > { %v998_v45 = vmul.f32 %v1861_v1, %v997_v42  ;;  %vm1019_vm4 = vcmp.eq.f32.partialorder %v1018_v19, 8.507059e+37  ;;  %v1064_v19 = vsub.f32 1.0, %v2321_v38 }
 0x1a6   : > { %v1863_v50 = vpop.eup %1862  ;;  %v999_v52 = vadd.f32 %v1861_v1, %v998_v45  ;;  %v447_v45 = vadd.s32 %v2114_v36, %v430_v27  ;;  %v1702_v36 = vpack.i.bf16 %v2267_v15, %v2282_v40  ;;  %v1063_v15 = vsub.f32 1.0, %v2306_v25  ;;  %v1098_v27 = vld [vmem:[%s2011_s8 + $0x68] sm:$0xff] }
 0x1a7   : > { %v1865_v54 = vpop.eup %1864  ;;  %v812_v55 = vadd.f32 1.0, %v1863_v50  ;;  %v1080_v40 = vsel %vm459_vm15, %v1064_v19, 0.0  ;;  %vm1422_vm15 = vcmask 531456  }
 0x1a8   : > { %v1003_v61 = vsel %vm1002_vm12, %v1861_v1, %v999_v52  ;;  %v1010_v62 = vmul.f32 %v1865_v54, %v811_v23  ;;  %vm1015_vm14 = vweird.f32 %v1865_v54  ;;  %v1692_v23 = vpack.i.bf16 %v2306_v25, %v2321_v38  ;;  %v1096_v38 = vld [vmem:[%s2011_s8 + $0x58] sm:$0xff] }
 0x1a9   : > { %1866 = vrcp.f32 %v812_v55  ;;  %v1008_v2 = vsel %vm1005_vm13, %v1007_v59, %v1003_v61  ;;  %vm1016_vm3 = vmor %vm1014_vm0, %vm1015_vm14  ;;  %v1034_v47 = vand.u32 2147483648, %v812_v55  ;;  %v1032_v52 = vand.u32 2147483647, %v812_v55 }
 0x1aa   : > { %v1050_v7 = vsel %vm461_vm11, %v1008_v2, 0.0  ;;  %v1011_v10 = vsub.f32 1.0, %v1010_v62  ;;  %vm1028_vm7 = vweird.f32 %v812_v55  ;;  %vm463_vm8 = vcmp.lt.s32.totalorder %v447_v45, 300 }
 0x1ab   : > { %1168 = vperm.xlu1 %1681, %v1050_v7   ;;  %v1682_v48 = vpack.i.bf16 %v2334_v39, %v1050_v7  ;;  %v1035_v59 = vor.u32 1.1754944e-38, %v1034_v47  ;;  %vm1033_vm12 = vcmp.eq.f32.partialorder %v1032_v52, 8.507059e+37  ;;  %v1066_v2 = vsub.f32 1.0, %v1050_v7  ;;  %v1091_v52 = vld [vmem:[%s2011_s8 + $0x30] sm:$0xff] }
 0x1ac   : > { %v1012_v16 = vmul.f32 %v1865_v54, %v1011_v10  ;;  %v1079_v5 = vsel %vm458_vm10, %v1063_v15, 0.0  ;;  %vm1405_vm10 = vcmask 523264  }
 0x1ad   : > { %1683 = vrot.lane.b32.xlu2 %v1682_v48, %s1910_s9  ;;  %v1082_v48 = vsel %vm461_vm11, %v1066_v2, 0.0  ;;  %vm1466_vm11 = vcmask 536576  }
 0x1ae   : > { %v1013_v22 = vadd.f32 %v1865_v54, %v1012_v16 }
 0x1af   : > { %v1867_v1 = vpop.eup %1866 }
 0x1b0   : > { %v1017_v31 = vsel %vm1016_vm3, %v1865_v54, %v1013_v22  ;;  %v1024_v35 = vmul.f32 %v1867_v1, %v812_v55  ;;  %vm1029_vm6 = vweird.f32 %v1867_v1  ;;  %v1065_v55 = vsub.f32 1.0, %v2334_v39 }
 0x1b1   : > { %v1022_v37 = vsel %vm1019_vm4, %v1021_v24, %v1017_v31  ;;  %vm1030_vm9 = vmor %vm1028_vm7, %vm1029_vm6  ;;  %v1697_v39 = vpack.i.bf16 %v1079_v5, %v1080_v40  ;;  %v1097_v24 = vld [vmem:[%s2011_s8 + $0x60] sm:$0xff]  ;;  %v1087_v40 = vld [vmem:[%s2011_s8 + $0x10] sm:$0xff] }
 0x1b2   : > { %v1051_v42 = vsel %vm462_vm1, %v1022_v37, 0.0  ;;  %v1025_v44 = vsub.f32 1.0, %v1024_v35  ;;  %v1081_v14 = vsel %vm460_vm5, %v1065_v55, 0.0 }
 0x1b3   : > { %1173 = vperm.xlu0 %1679, %v1051_v42   ;;  %1113 = vperm.xlu1 %1681, %v2165_v46   ;;  %v1687_v16 = vpack.i.bf16 %v1081_v14, %v1082_v48  ;;  %v1067_v33 = vsub.f32 1.0, %v1051_v42  ;;  %v1089_v48 = vld [vmem:[%s2011_s8 + $0x20] sm:$0xff] }
 0x1b4   : > { %v1026_v50 = vmul.f32 %v1867_v1, %v1025_v44  ;;  %v1099_v44 = vld [vmem:[%s2011_s8 + $0x70] sm:$0xff] }
 0x1b5   : > { %1693 = vrot.lane.b32.xlu2 %v1692_v23, %s1910_s9  ;;  %v1083_v57 = vsel %vm462_vm1, %v1067_v33, 0.0  ;;  %v1100_v23 = vld [vmem:[%s2011_s8 + $0x78] sm:$0xff] }
 0x1b6   : > { %v1027_v54 = vadd.f32 %v1867_v1, %v1026_v50 }
 0x1b8   : > { %v1031_v60 = vsel %vm1030_vm9, %v1867_v1, %v1027_v54 }
 0x1b9   : > { %v1036_v61 = vsel %vm1033_vm12, %v1035_v59, %v1031_v60  ;;  %v1092_v60 = vld [vmem:[%s2011_s8 + $0x38] sm:$0xff] }
 0x1ba   : > { %v1052_v62 = vsel %vm463_vm8, %v1036_v61, 0.0 }
 0x1bb   : > { %1178 = vperm.xlu0 %1679, %v1052_v62   ;;  %v1712_v10 = vpack.i.bf16 %v1051_v42, %v1052_v62  ;;  %v1068_v25 = vsub.f32 1.0, %v1052_v62 }
 0x1bd   : > { %1703 = vrot.lane.b32.xlu2 %v1702_v36, %s1910_s9 }
 0x1c3   : > { %1103 = vperm.xlu0 %1679, %v2129_v63  }
 0x1c5   : > { %1713 = vrot.lane.b32.xlu2 %v1712_v10, %s1910_s9  ;;  %v1090_v10 = vld [vmem:[%s2011_s8 + $0x28] sm:$0xff] }
 0x1c7   : > { %v2404_v46 = vpop.permute.xlu0 %1118 }
 0x1cb   : > { %1688 = vrot.lane.b32.xlu0 %v1687_v16, %s1911_s21 }
 0x1cd   : > { %1748 = vrot.lane.b32.xlu2 %v1747_v32, %s1910_s9  ;;  %v1084_v32 = vsel %vm463_vm8, %v1068_v25, 0.0  ;;  %v1088_v25 = vld [vmem:[%s2011_s8 + $0x18] sm:$0xff] }
 0x1ce   : > { %v1717_v17 = vpack.i.bf16 %v1083_v57, %v1084_v32  ;;  %v2476_v32 = vmul.f32 %v2404_v46, %v1088_v25 }
 0x1d3   : > { %1698 = vrot.lane.b32.xlu0 %v1697_v39, %s1911_s21 }
 0x1d5   : > { %1763 = vrot.lane.b32.xlu2 %v1762_v49, %s1910_s9  ;;  %v1124_v49 = vpop.permute.xlu2 %1123 }
 0x1d6   : > { %v2466_v19 = vmul.f32 %v1124_v49, %v1089_v48  ;;  %v1200_v49 = vsub.f32 %v1088_v25, %v2476_v32 }
 0x1d7   : > { %v1129_v29 = vpop.permute.xlu1 %1128 }
 0x1d8   : > { %v2464_v14 = vmul.f32 %v1129_v29, %v1090_v10  ;;  %v1201_v39 = vsub.f32 %v1089_v48, %v2466_v19 }
 0x1da   : > { %v1202_v15 = vsub.f32 %v1090_v10, %v2464_v14 }
 0x1db   : > { %1708 = vrot.lane.b32.xlu0 %v1707_v9, %s1911_s21 }
 0x1dc   : > { %v1757_v33 = vpack.i.bf16 %v1201_v39, %v1202_v15 }
 0x1dd   : > { %1778 = vrot.lane.b32.xlu2 %v1777_v6, %s1910_s9  ;;  %v1139_v58 = vpop.permute.xlu2 %1138 }
 0x1de   : > { %v2457_v36 = vmul.f32 %v1139_v58, %v1092_v60  ;;  %v1086_v58 = vld [vmem:[%s2011_s8 + $0x8] sm:$0xff] }
 0x1df   : > { %v1134_v63 = vpop.permute.xlu0 %1133 }
 0x1e0   : > { %v2455_v61 = vmul.f32 %v1134_v63, %v1091_v52  ;;  %v1204_v55 = vsub.f32 %v1092_v60, %v2457_v36 }
 0x1e2   : > { %v1203_v2 = vsub.f32 %v1091_v52, %v2455_v61 }
 0x1e3   : > { %1718 = vrot.lane.b32.xlu0 %v1717_v17, %s1911_s21  ;;  %v1085_v17 = vld [vmem:[%s2011_s8] sm:$0xff] }
 0x1e4   : > { %v1742_v16 = vpack.i.bf16 %v1203_v2, %v1204_v55 }
 0x1e5   : > { %1793 = vrot.lane.b32.xlu2 %v1792_v43, %s1910_s9 }
 0x1eb   : > { %1753 = vrot.lane.b32.xlu0 %v1752_v51, %s1911_s21 }
 0x1ed   : > { %v1154_v11 = vpop.permute.xlu2 %1153 }
 0x1f3   : > { %1768 = vrot.lane.b32.xlu0 %v1767_v56, %s1911_s21  ;;  %v1095_v56 = vld [vmem:[%s2011_s8 + $0x50] sm:$0xff] }
 0x1f4   : > { %v2430_v3 = vmul.f32 %v1154_v11, %v1095_v56 }
 0x1f5   : > { %v1144_v9 = vpop.permute.xlu1 %1143  ;;  %v1159_v12 = vpop.permute.xlu2 %1158 }
 0x1f6   : > { %v2416_v41 = vmul.f32 %v1144_v9, %v1093_v0  ;;  %v2424_v7 = vmul.f32 %v1159_v12, %v1096_v38 }
 0x1f8   : > { %v1205_v26 = vsub.f32 %v1093_v0, %v2416_v41  ;;  %v1208_v4 = vsub.f32 %v1096_v38, %v2424_v7 }
 0x1fb   : > { %1783 = vrot.lane.b32.xlu0 %v1782_v8, %s1911_s21  ;;  %v1207_v8 = vsub.f32 %v1095_v56, %v2430_v3 }
 0x1fd   : > { %v1149_v51 = vpop.permute.xlu0 %1148  ;;  %v1727_v22 = vpack.i.bf16 %v1207_v8, %v1208_v4  ;;  %v1109_v29 = vpop.permute.xlu2 %1108 }
 0x1fe   : > { %v2418_v30 = vmul.f32 %v1149_v51, %v1094_v20  ;;  %v2485_v0 = vmul.f32 %v1109_v29, %v1086_v58 }
 0x200   : > { %v1206_v53 = vsub.f32 %v1094_v20, %v2418_v30  ;;  %v1198_v9 = vsub.f32 %v1086_v58, %v2485_v0 }
 0x202   : > { %v1722_v13 = vpack.i.bf16 %v1205_v26, %v1206_v53 }
 0x203   : > { %1798 = vrot.lane.b32.xlu0 %v1797_v28, %s1911_s21 }
 0x204   : > { %1723 = vrot.lane.b32.xlu1 %v1722_v13, %s1912_s16 }
 0x207   : > { %v1684_v51 = vpop.permute.xlu2 %1683 }
 0x20c   : > { %1728 = vrot.lane.b32.xlu1 %v1727_v22, %s1912_s16 }
 0x20f   : > { %v1694_v12 = vpop.permute.xlu2 %1693 }
 0x210   : > { %v1695_v25 = vunpack.i.l.bf16 %v1694_v12  ;;  %v1696_v58 = vunpack.i.h.bf16 %v1694_v12 }
 0x215   : > { %v1164_v1 = vpop.permute.xlu1 %1163 }
 0x216   : > { %v2438_v18 = vmul.f32 %v1164_v1, %v1097_v24 }
 0x217   : > { %v2493_v56 = vpop.permute.xlu2 %1703 }
 0x218   : > { %v1209_v31 = vsub.f32 %v1097_v24, %v2438_v18 }
 0x21d   : > { %v1169_v21 = vpop.permute.xlu1 %1168 }
 0x21e   : > { %v2440_v28 = vmul.f32 %v1169_v21, %v1098_v27 }
 0x21f   : > { %v1714_v8 = vpop.permute.xlu2 %1713 }
 0x220   : > { %v1210_v35 = vsub.f32 %v1098_v27, %v2440_v28 }
 0x222   : > { %v1732_v37 = vpack.i.bf16 %v1209_v31, %v1210_v35 }
 0x224   : > { %1733 = vrot.lane.b32.xlu1 %v1732_v37, %s1912_s16 }
 0x225   : > { %v1174_v42 = vpop.permute.xlu0 %1173  ;;  %v1114_v5 = vpop.permute.xlu1 %1113 }
 0x226   : > { %v2447_v45 = vmul.f32 %v1174_v42, %v1099_v44  ;;  %v2473_v6 = vmul.f32 %v1114_v5, %v1087_v40  ;;  %v1716_v42 = vunpack.i.h.bf16 %v1714_v8 }
 0x227   : > { %v2497_v21 = vpop.permute.xlu2 %1748 }
 0x228   : > { %v1211_v54 = vsub.f32 %v1099_v44, %v2447_v45  ;;  %v1199_v57 = vsub.f32 %v1087_v40, %v2473_v6  ;;  %v1715_v44 = vunpack.i.l.bf16 %v1714_v8 }
 0x22a   : > { %v1772_v11 = vpack.i.bf16 %v1199_v57, %v1200_v49 }
 0x22d   : > { %v1179_v47 = vpop.permute.xlu0 %1178 }
 0x22e   : > { %v2449_v50 = vmul.f32 %v1179_v47, %v1100_v23 }
 0x230   : > { %v1212_v59 = vsub.f32 %v1100_v23, %v2449_v50 }
 0x232   : > { %v1737_v62 = vpack.i.bf16 %v1211_v54, %v1212_v59 }
 0x234   : > { %1738 = vrot.lane.b32.xlu1 %v1737_v62, %s1912_s16  ;;  %v1685_v62 = vunpack.i.l.bf16 %v1684_v51 }
 0x235   : > { %v1104_v43 = vpop.permute.xlu0 %1103 }
 0x236   : > { %v2483_v63 = vmul.f32 %v1104_v43, %v1085_v17 }
 0x238   : > { %v1197_v46 = vsub.f32 %v1085_v17, %v2483_v63 }
 0x23a   : > { %v1787_v20 = vpack.i.bf16 %v1197_v46, %v1198_v9 }
 0x23c   : > { %1743 = vrot.lane.b32.xlu1 %v1742_v16, %s1912_s16 }
 0x23d   : > { %v1689_v38 = vpop.permute.xlu0 %1688 }
 0x23e   : > { %v1690_v40 = vunpack.i.l.bf16 %v1689_v38  ;;  %v1691_v17 = vunpack.i.h.bf16 %v1689_v38 }
 0x244   : > { %1758 = vrot.lane.b32.xlu1 %v1757_v33, %s1912_s16 }
 0x245   : > { %v2491_v26 = vpop.permute.xlu0 %1698 }
 0x246   : > { %v1700_v46 = vunpack.i.l.bf16 %v2491_v26 }
 0x24c   : > { %1773 = vrot.lane.b32.xlu1 %v1772_v11, %s1912_s16  ;;  %v1764_v11 = vpop.permute.xlu2 %1763 }
 0x24d   : > { %v2495_v13 = vpop.permute.xlu0 %1708 }
 0x254   : > { %1788 = vrot.lane.b32.xlu1 %v1787_v20, %s1912_s16 }
 0x255   : > { %v1719_v22 = vpop.permute.xlu0 %1718 }
 0x256   : > { %v1720_v23 = vunpack.i.l.bf16 %v1719_v22  ;;  %v1721_v55 = vunpack.i.h.bf16 %v1719_v22  ;;  %v1706_v22 = vunpack.i.h.bf16 %v2493_v56 }
 0x25d   : > { %v2499_v47 = vpop.permute.xlu0 %1753 }
 0x265   : > { %v1769_v38 = vpop.permute.xlu0 %1768 }
 0x276   : > { %v1724_v53 = vpop.permute.xlu1 %1723 }
 0x277   : > { %v1725_v5 = vunpack.i.l.bf16 %v1724_v53  ;;  %v1726_v43 = vunpack.i.h.bf16 %v1724_v53 }
 0x279   : > { %v1398_v20 = vsel %vm635_vm2, %v2418_v30, %v1725_v5  ;;  %v1397_v8 = vsel %vm635_vm2, %v2416_v41, %v1726_v43  ;;  %v1710_v30 = vunpack.i.l.bf16 %v2495_v13 }
 0x27a   : > { %v1414_v41 = vsel %vm1405_vm10, %v1397_v8, %v1706_v22 }
 0x27e   : > { %v1729_v4 = vpop.permute.xlu1 %1728 }
 0x27f   : > { %v1730_v52 = vunpack.i.l.bf16 %v1729_v4  ;;  %v1731_v48 = vunpack.i.h.bf16 %v1729_v4 }
 0x281   : > { %v1400_v39 = vsel %vm635_vm2, %v2424_v7, %v1730_v52  ;;  %v1399_v49 = vsel %vm635_vm2, %v2430_v3, %v1731_v48  ;;  %v1701_v3 = vunpack.i.h.bf16 %v2491_v26  ;;  %v1750_v26 = vunpack.i.l.bf16 %v2497_v21 }
 0x282   : > { %v1417_v29 = vsel %vm1405_vm10, %v1400_v39, %v1695_v25  ;;  %v1416_v53 = vsel %vm1405_vm10, %v1399_v49, %v1696_v58  ;;  %v1755_v52 = vunpack.i.l.bf16 %v2499_v47 }
 0x283   : > { %v1434_v4 = vsel %vm1422_vm15, %v1417_v29, %v1700_v46 }
 0x296   : > { %v1734_v1 = vpop.permute.xlu1 %1733 }
 0x297   : > { %v1735_v24 = vunpack.i.l.bf16 %v1734_v1  ;;  %v1736_v31 = vunpack.i.h.bf16 %v1734_v1 }
 0x299   : > { %v1402_v60 = vsel %vm635_vm2, %v2440_v28, %v1735_v24  ;;  %v1401_v15 = vsel %vm635_vm2, %v2438_v18, %v1736_v31  ;;  %v1433_v24 = vsel %vm1422_vm15, %v1416_v53, %v1701_v3  ;;  %v1711_v31 = vunpack.i.h.bf16 %v2495_v13 }
 0x29b   : > { %v1431_v13 = vsel %vm1422_vm15, %v1414_v41, %v1711_v31 }
 0x2a6   : > { %v1739_v27 = vpop.permute.xlu1 %1738 }
 0x2a7   : > { %v1741_v35 = vunpack.i.h.bf16 %v1739_v27  ;;  %v1740_v37 = vunpack.i.l.bf16 %v1739_v27 }
 0x2a9   : > { %v1404_v54 = vsel %vm635_vm2, %v2449_v50, %v1740_v37  ;;  %v1403_v59 = vsel %vm635_vm2, %v2447_v45, %v1741_v35  ;;  %v1686_v50 = vunpack.i.h.bf16 %v1684_v51  ;;  %v1419_v45 = vsel %vm1405_vm10, %v1402_v60, %v1685_v62  ;;  %v1779_v62 = vpop.permute.xlu2 %1778 }
 0x2aa   : > { %v1421_v2 = vsel %vm1405_vm10, %v1404_v54, %v1715_v44  ;;  %v1420_v10 = vsel %vm1405_vm10, %v1403_v59, %v1716_v42  ;;  %v1436_v18 = vsel %vm1422_vm15, %v1419_v45, %v1690_v40  ;;  %v1705_v51 = vunpack.i.l.bf16 %v2493_v56 }
 0x2ab   : > { %v1438_v16 = vsel %vm1422_vm15, %v1421_v2, %v1720_v23  ;;  %v1437_v28 = vsel %vm1422_vm15, %v1420_v10, %v1721_v55  ;;  %v1418_v57 = vsel %vm1405_vm10, %v1401_v15, %v1686_v50  ;;  %v1751_v23 = vunpack.i.h.bf16 %v2497_v21  ;;  %v1784_v55 = vpop.permute.xlu0 %1783 }
 0x2ac   : > { %1445 = vmatpush.msrb.mxu2 %v1438_v16  ;;  %v1435_v9 = vsel %vm1422_vm15, %v1418_v57, %v1691_v17  ;;  %v1415_v1 = vsel %vm1405_vm10, %v1398_v20, %v1705_v51  ;;  %v1765_v59 = vunpack.i.l.bf16 %v1764_v11  ;;  %v1756_v2 = vunpack.i.h.bf16 %v2499_v47  ;;  %v1803_v20 = vld [vmem:[%s2606_s24] ss:$0 sm:$0xff] }
 0x2ad   : > { %v1432_v42 = vsel %vm1422_vm15, %v1415_v1, %v1710_v30  ;;  %v1766_v10 = vunpack.i.h.bf16 %v1764_v11  ;;  %v1770_v16 = vunpack.i.l.bf16 %v1769_v38  ;;  %v1771_v45 = vunpack.i.h.bf16 %v1769_v38 }
 0x2ae   : > { %v1744_v33 = vpop.permute.xlu1 %1743  ;;  %1446 = vmatpush.msrb.mxu2 %v1437_v28  ;;  %v1781_v28 = vunpack.i.h.bf16 %v1779_v62  ;;  %v1780_v39 = vunpack.i.l.bf16 %v1779_v62  ;;  %vm1441_vm5 = vcmp.eq.s32.totalorder %v2112_v34, %v1803_v20  ;;  %v1913_v1 = vmov 1.0  }
 0x2af   : > { %v1745_v7 = vunpack.i.l.bf16 %v1744_v33  ;;  %v1746_v12 = vunpack.i.h.bf16 %v1744_v33 }
 0x2b0   : > { %1447 = vmatpush.msrb.mxu2 %v1436_v18  ;;  %v1786_v18 = vunpack.i.h.bf16 %v1784_v55 }
 0x2b1   : > { %v1396_v27 = vsel %vm635_vm2, %v2457_v36, %v1745_v7  ;;  %v1395_v44 = vsel %vm635_vm2, %v2455_v61, %v1746_v12  ;;  %v1794_v58 = vpop.permute.xlu2 %1793 }
 0x2b2   : > { %1448 = vmatpush.msrb.mxu2 %v1435_v9  ;;  %v1413_v36 = vsel %vm1405_vm10, %v1396_v27, %v1750_v26  ;;  %v1412_v60 = vsel %vm1405_vm10, %v1395_v44, %v1751_v23  ;;  %v1796_v9 = vunpack.i.h.bf16 %v1794_v58 }
 0x2b3   : > { %v1430_v61 = vsel %vm1422_vm15, %v1413_v36, %v1755_v52  ;;  %v1799_v11 = vpop.permute.xlu0 %1798 }
 0x2b4   : > { %1449 = vmatpush.msrb.mxu2 %v1434_v4  ;;  %v1800_v51 = vunpack.i.l.bf16 %v1799_v11  ;;  %v1801_v4 = vunpack.i.h.bf16 %v1799_v11 }
 0x2b6   : > { %v1759_v35 = vpop.permute.xlu1 %1758  ;;  %1450 = vmatpush.msrb.mxu2 %v1433_v24 }
 0x2b7   : > { %v1761_v37 = vunpack.i.h.bf16 %v1759_v35  ;;  %v1760_v56 = vunpack.i.l.bf16 %v1759_v35 }
 0x2b8   : > { %1451 = vmatpush.msrb.mxu2 %v1432_v42 }
 0x2b9   : > { %v1394_v54 = vsel %vm635_vm2, %v2464_v14, %v1760_v56  ;;  %v1393_v21 = vsel %vm635_vm2, %v2466_v19, %v1761_v37  ;;  %v1429_v14 = vsel %vm1422_vm15, %v1412_v60, %v1756_v2  ;;  %v1785_v19 = vunpack.i.l.bf16 %v1784_v55 }
 0x2ba   : > { %1452 = vmatpush.msrb.mxu2 %v1431_v13  ;;  %v1411_v48 = vsel %vm1405_vm10, %v1394_v54, %v1765_v59  ;;  %v1410_v50 = vsel %vm1405_vm10, %v1393_v21, %v1766_v10 }
 0x2bb   : > { %v1428_v5 = vsel %vm1422_vm15, %v1411_v48, %v1770_v16  ;;  %v1427_v25 = vsel %vm1422_vm15, %v1410_v50, %v1771_v45 }
 0x2bc   : > { %1453 = vmatpush.msrb.mxu2 %v1430_v61 }
 0x2be   : > { %v1774_v15 = vpop.permute.xlu1 %1773  ;;  %1454 = vmatpush.msrb.mxu2 %v1429_v14 }
 0x2bf   : > { %v1776_v40 = vunpack.i.h.bf16 %v1774_v15  ;;  %v1775_v47 = vunpack.i.l.bf16 %v1774_v15 }
 0x2c0   : > { %1455 = vmatpush.msrb.mxu2 %v1428_v5 }
 0x2c1   : > { %v1392_v33 = vsel %vm635_vm2, %v2476_v32, %v1775_v47  ;;  %v1391_v57 = vsel %vm635_vm2, %v2473_v6, %v1776_v40  ;;  %v1795_v6 = vunpack.i.l.bf16 %v1794_v58 }
 0x2c2   : > { %1456 = vmatpush.msrb.mxu2 %v1427_v25  ;;  %v1409_v17 = vsel %vm1405_vm10, %v1392_v33, %v1780_v39  ;;  %v1408_v43 = vsel %vm1405_vm10, %v1391_v57, %v1781_v28 }
 0x2c3   : > { %v1426_v49 = vsel %vm1422_vm15, %v1409_v17, %v1785_v19  ;;  %v1425_v29 = vsel %vm1422_vm15, %v1408_v43, %v1786_v18 }
 0x2c4   : > { %1457 = vmatpush.msrb.mxu2 %v1426_v49 }
 0x2c6   : > { %v1789_v46 = vpop.permute.xlu1 %1788  ;;  %1458 = vmatpush.msrb.mxu2 %v1425_v29 }
 0x2c7   : > { %v1791_v32 = vunpack.i.h.bf16 %v1789_v46  ;;  %v1790_v7 = vunpack.i.l.bf16 %v1789_v46 }
 0x2c9   : > { %v1390_v38 = vsel %vm635_vm2, %v2485_v0, %v1790_v7  ;;  %v1389_v53 = vsel %vm635_vm2, %v2483_v63, %v1791_v32  ;;  %v1444_v0 = vld [vmem:[%s2016_s10] sm:$0x1f] }
 0x2ca   : > { %v1407_v3 = vsel %vm1405_vm10, %v1390_v38, %v1795_v6  ;;  %v1406_v12 = vsel %vm1405_vm10, %v1389_v53, %v1796_v9 }
 0x2cb   : > { %v1424_v8 = vsel %vm1422_vm15, %v1407_v3, %v1800_v51  ;;  %v1423_v22 = vsel %vm1422_vm15, %v1406_v12, %v1801_v4 }
 0x2cc   : > { %1459 = vmatpush.msrb.mxu2 %v1424_v8 }
 0x2ce   : > { %1460 = vmatpush.msrb.mxu2 %v1423_v22 }
 0x2cf   : > { %1625 = vmatmul.msk.f32.vlgmr.msrb.gmra.mxu2 %vm1441_vm5, %v1913_v1 }
 0x352   : > { %v1462_v30 = vpop.f32.mrf.mxu2 }
 0x353   : > { %v1465_v24 = vadd.f32 %v1462_v30, %v1444_v0 }
 0x355   : > { %1467 = vst.msk [vmem:[%s2016_s10] sm:$0x1f] %vm1466_vm11, %v1465_v24 }
 0x356 PF: > { %s17_s28 = sadd.s32 1, %s1906_s28   ;;  %s2607_s24 = smov %s1898_s26 }
 0x357   : > { %p14_p9 = scmp.ge.s32.totalorder %s17_s28, 6   ;;  %s2608_s25 = smov %s1902_s27 }
 0x358   : > { %s2609_s26 = smov %s2612_s29  ;;  %s2610_s27 = smov %s2616_s30 }
 0x359   :  { %16 = sbr.rel (!%p14_p9) target bundleno = 3 (0x3), region = 91 }

</bundles_post_ra>
